<compile_context>
chip_gen: v5e
topology: v5e:2x2
jax: 0.10.0
libtpu: 0.0.40
codegen_flags: <defaults>
</compile_context>

<pallas_src>
import numpy as np
import jax
import jax.numpy as jnp
from jax.experimental import pallas as pl
from jax.experimental.pallas import tpu as pltpu

_BN_EPS = 1e-5
_LANE = 128


def _round_up(x, m):
    return (x + m - 1) // m * m


def _pick_d_tile(D, requested=None):
    """Depth-slab size: largest divisor of D that is <= 4 (keeps >=2 grid steps
    for megacore even when N == 1, and M = Dt*HW = 256 fills the MXU rows)."""
    if requested is not None:
        if D % requested:
            raise ValueError(f"d_tile={requested} must divide D={D}")
        return requested
    for t in range(min(D, 4), 0, -1):
        if D % t == 0:
            return t
    return 1


def _interp_matrix_1d(size):
    """(2*size, size) linear-interp matrix: scale_factor=2, align_corners=False.
    All entries are products/sums of {0, 0.25, 0.75, 1} -> exact in bf16."""
    u = np.zeros((2 * size, size), np.float32)
    for o in range(2 * size):
        c = min(max((o + 0.5) / 2.0 - 0.5, 0.0), float(size - 1))
        i0 = int(np.floor(c))
        i1 = min(i0 + 1, size - 1)
        f = c - i0
        u[o, i0] += 1.0 - f
        u[o, i1] += f
    return u


def _fold_bn(params, eps=_BN_EPS):
    """Fold eval-mode BatchNorm3d (running stats) into the 1x1x1 conv."""
    s = params["gamma"] / jnp.sqrt(params["var"] + eps)
    w_eff = params["w"] * s[None, :]
    b_eff = (params["b"] - params["mean"]) * s + params["beta"]
    return w_eff, b_eff


# ---------------------------------------------------------------------------
# Fused kernel: conv1x1x1 + BN + ReLU + trilinear(x2) upsample, one depth slab
# per grid step.
# ---------------------------------------------------------------------------
def _upblock_kernel(x_slab_ref, x_lo_ref, x_hi_ref, w_ref, b_ref, u_ref, o_ref):
    dt = x_slab_ref.shape[1]             # Dt planes in this slab
    hw = x_slab_ref.shape[2]             # H*W
    w = w_ref[...]                       # (Cin, Cp) bf16, BN scale folded in
    b = b_ref[...]                       # (1,  Cp) f32,  BN shift folded in
    cp = w.shape[1]

    # --- conv + BN + ReLU -------------------------------------------------
    # Whole slab in one MXU matmul: M = Dt*HW rows (fills the 256-row MXU).
    x_slab = x_slab_ref[...].reshape(dt * hw, -1)                  # bf16
    y_slab = jnp.maximum(
        jnp.dot(x_slab, w, preferred_element_type=jnp.float32) + b, 0.0)
    y_slab = y_slab.reshape(dt, hw, cp)                            # f32

    def conv1(x_ref):                    # single halo plane
        return jnp.maximum(
            jnp.dot(x_ref[0, 0], w, preferred_element_type=jnp.float32) + b, 0.0)

    y_lo = conv1(x_lo_ref)               # plane d0-1 (edge-clamped in index_map)
    y_hi = conv1(x_hi_ref)               # plane d0+Dt (edge-clamped)

    # --- depth interpolation (align_corners=False, scale 2) ----------------
    #   out[2d]   = 0.75*y[d] + 0.25*y[d-1]   (edge clamped)
    #   out[2d+1] = 0.75*y[d] + 0.25*y[d+1]   (edge clamped)
    # Blends are cast to bf16 and concatenated along the lane axis (output-
    # plane order) so the H/W stencil is applied as ONE wide matmul.
    blends = []
    for j in range(dt):
        y_c = y_slab[j]
        y_p = y_lo if j == 0 else y_slab[j - 1]
        y_n = y_hi if j == dt - 1 else y_slab[j + 1]
        blends.append((0.75 * y_c + 0.25 * y_p).astype(jnp.bfloat16))  # plane 2j
        blends.append((0.75 * y_c + 0.25 * y_n).astype(jnp.bfloat16))  # plane 2j+1
    blend_cat = jnp.concatenate(blends, axis=-1)        # (HW, 2*Dt*Cp) bf16

    # --- H/W interpolation: one MXU matmul against the kron'd stencil ------
    u = u_ref[...]                                       # (4HW, HW) bf16 (exact)
    res = jnp.dot(u, blend_cat, preferred_element_type=jnp.float32)  # (4HW, 2Dt*Cp)

    for p in range(2 * dt):
        o_ref[0, p] = res[:, p * cp:(p + 1) * cp].astype(o_ref.dtype)  # bf16 stores


def unet_block_up(x, params, *, d_tile=None, eps=_BN_EPS):
    """UnetBlock_Up forward.
    x: (N, D, H, W, Cin) f32 -> (N, 2D, 2H, 2W, Cout) bf16."""
    N, D, H, W, Cin = x.shape
    Cout = params["w"].shape[1]
    Cp = _round_up(Cout, _LANE)          # lane-dense output stores
    HW, OHW = H * W, 4 * H * W
    Dt = _pick_d_tile(D, d_tile)
    n_slab = D // Dt

    w_eff, b_eff = _fold_bn(params, eps)
    if Cp != Cout:
        w_eff = jnp.pad(w_eff, ((0, 0), (0, Cp - Cout)))
        b_eff = jnp.pad(b_eff, ((0, Cp - Cout),))

    # bf16 at the kernel boundary (halves HBM/VMEM traffic, 2x MXU rate);
    # accumulation stays f32 inside the kernel.
    x_flat = x.reshape(N, D, HW, Cin).astype(jnp.bfloat16)
    w_bf = w_eff.astype(jnp.bfloat16)
    b_f32 = b_eff.reshape(1, Cp).astype(jnp.float32)

    # Constant H/W interpolation stencil; rows are already in the interleaved
    # (2H, 2W) row-major order, so the second matmul emits the final layout.
    # Weights are exactly representable in bf16.
    u_hw = jnp.asarray(np.kron(_interp_matrix_1d(H), _interp_matrix_1d(W)),
                       dtype=jnp.bfloat16)

    slab_spec = pl.BlockSpec((1, Dt, HW, Cin), lambda n, s: (n, s, 0, 0))
    # Halo planes (block size 1 along D => block index == plane index); the
    # edge clamp lives in the index_map so the kernel never branches.
    lo_spec = pl.BlockSpec((1, 1, HW, Cin),
                           lambda n, s: (n, jnp.maximum(s * Dt - 1, 0), 0, 0))
    hi_spec = pl.BlockSpec((1, 1, HW, Cin),
                           lambda n, s: (n, jnp.minimum(s * Dt + Dt, D - 1), 0, 0))

    out = pl.pallas_call(
        _upblock_kernel,
        out_shape=jax.ShapeDtypeStruct((N, 2 * D, OHW, Cp), jnp.bfloat16),
        grid=(N, n_slab),
        in_specs=[
            slab_spec,                                       # Dt planes of x
            lo_spec,                                         # plane d0-1 (clamped)
            hi_spec,                                         # plane d0+Dt (clamped)
            pl.BlockSpec((Cin, Cp), lambda n, s: (0, 0)),    # folded conv weight
            pl.BlockSpec((1, Cp), lambda n, s: (0, 0)),      # folded bias
            pl.BlockSpec((OHW, HW), lambda n, s: (0, 0)),    # H/W interp stencil
        ],
        out_specs=pl.BlockSpec((1, 2 * Dt, OHW, Cp), lambda n, s: (n, s, 0, 0)),
        compiler_params=pltpu.CompilerParams(
            dimension_semantics=("parallel", "parallel"),
            # ~3 MiB/step at the test size; 32 MiB is within every generation's
            # scoped budget (v7x included).
            vmem_limit_bytes=32 * 1024 * 1024,
        ),
    )(x_flat, x_flat, x_flat, w_bf, b_f32, u_hw)

    out = out.reshape(N, 2 * D, 2 * H, 2 * W, Cp)   # free row-major split
    if Cp != Cout:
        # TODO(synk): this slice costs a full extra HBM round-trip of the output;
        # keep Cout a multiple of 128 downstream to avoid it (no-op here).
        out = out[..., :Cout]
    return out


# ---------------------------------------------------------------------------
# Parameters & pure-JAX reference (validation only)
# ---------------------------------------------------------------------------
def make_params(key, cin, cout):
    k = jax.random.split(key, 6)
    return {
        "w": jax.random.normal(k[0], (cin, cout), jnp.float32) / np.sqrt(cin),
        "b": 0.01 * jax.random.normal(k[1], (cout,), jnp.float32),
        "gamma": 1.0 + 0.1 * jax.random.normal(k[2], (cout,), jnp.float32),
        "beta": 0.05 * jax.random.normal(k[3], (cout,), jnp.float32),
        "mean": 0.1 * jax.random.normal(k[4], (cout,), jnp.float32),   # running_mean
        "var": 0.5 + jax.random.uniform(k[5], (cout,), jnp.float32),   # running_var
    }


def _upsample1d_ref(x, axis):
    s = x.shape[axis]
    o = jnp.arange(2 * s, dtype=jnp.float32)
    c = jnp.clip((o + 0.5) / 2.0 - 0.5, 0.0, float(s - 1))
    i0 = jnp.floor(c).astype(jnp.int32)
    i1 = jnp.minimum(i0 + 1, s - 1)
    f = (c - i0.astype(jnp.float32)).reshape(
        [-1 if a == axis else 1 for a in range(x.ndim)])
    return jnp.take(x, i0, axis=axis) * (1.0 - f) + jnp.take(x, i1, axis=axis) * f


def unet_block_up_reference(x, params, eps=_BN_EPS):
    """Pure-JAX f32 reference (uses XLA gather; validation only)."""
    w_eff, b_eff = _fold_bn(params, eps)
    xr = x.astype(jnp.bfloat16).astype(jnp.float32)       # match kernel's bf16 boundary
    wr = w_eff.astype(jnp.bfloat16).astype(jnp.float32)
    y = jnp.maximum(jnp.einsum("ndhwc,co->ndhwo", xr, wr) + b_eff, 0.0)
    for ax in (1, 2, 3):
        y = _upsample1d_ref(y, ax)
    return y


# ---------------------------------------------------------------------------
if __name__ == "__main__":
    # PyTorch input would be NCDHW; the kernel works in NDHWC.
    N, D, H, W = 2, 8, 8, 8
    C_IN, C_OUT = 256, 128     # e.g. UNet_Seg "up1": 8*inchn -> 4*inchn (inchn=32)

    kx, kp = jax.random.split(jax.random.PRNGKey(0))
    x_ncdhw = jax.random.normal(kx, (N, C_IN, D, H, W), jnp.float32)
    x = jnp.transpose(x_ncdhw, (0, 2, 3, 4, 1))            # NCDHW -> NDHWC

    params = make_params(kp, C_IN, C_OUT)

    out = jax.block_until_ready(jax.jit(unet_block_up)(x, params))
    assert out.shape == (N, 2 * D, 2 * H, 2 * W, C_OUT), out.shape
    assert out.dtype == jnp.bfloat16, out.dtype
    out_f32 = out.astype(jnp.float32)
    assert bool(jnp.isfinite(out_f32).all()), "non-finite output"

    ref = jax.block_until_ready(jax.jit(unet_block_up_reference)(x, params))
    err = float(jnp.max(jnp.abs(out_f32 - ref)))
    # bf16 depth-blend + bf16 output rounding: allow ~2 bf16 ULPs at |y| ~ 8.
    assert err < 7.5e-2, f"max abs error vs f32 reference: {err}"

    print("KERNEL_OK")
</pallas_src>

<mosaic_0001>
module attributes {stable_mosaic.version = 11 : i64} {
  func.func @_upblock_kernel(%arg0: i32, %arg1: i32, %arg2: memref<1x4x64x256xbf16, #tpu.memory_space<vmem>>, %arg3: memref<1x1x64x256xbf16, #tpu.memory_space<vmem>>, %arg4: memref<1x1x64x256xbf16, #tpu.memory_space<vmem>>, %arg5: memref<256x128xbf16, #tpu.memory_space<vmem>>, %arg6: memref<1x128xf32, #tpu.memory_space<vmem>>, %arg7: memref<256x64xbf16, #tpu.memory_space<vmem>>, %arg8: memref<1x8x256x128xbf16, #tpu.memory_space<vmem>>) attributes {dimension_semantics = [#tpu.dimension_semantics<parallel>, #tpu.dimension_semantics<parallel>], iteration_bounds = array<i64: 2, 2>, scalar_prefetch = 0 : i64, scratch_operands = 0 : i64, tpu.core_type = #tpu.core_type<tc>, window_params = [{transform_indices = @transform_0, window_bounds = array<i64: 1, 4, 64, 256>}, {transform_indices = @transform_1, window_bounds = array<i64: 1, 1, 64, 256>}, {transform_indices = @transform_2, window_bounds = array<i64: 1, 1, 64, 256>}, {pipeline_mode = #tpu.pipeline_mode<synchronous>, transform_indices = @transform_3, window_bounds = array<i64: 256, 128>}, {pipeline_mode = #tpu.pipeline_mode<synchronous>, transform_indices = @transform_4, window_bounds = array<i64: 1, 128>}, {pipeline_mode = #tpu.pipeline_mode<synchronous>, transform_indices = @transform_5, window_bounds = array<i64: 256, 64>}, {transform_indices = @transform_6, window_bounds = array<i64: 1, 8, 256, 128>}]} {
    %c0 = arith.constant 0 : index
    %c0_0 = arith.constant 0 : index
    %0 = vector.load %arg5[%c0, %c0_0] : memref<256x128xbf16, #tpu.memory_space<vmem>>, vector<256x128xbf16>
    %c0_1 = arith.constant 0 : index
    %c0_2 = arith.constant 0 : index
    %1 = vector.load %arg6[%c0_1, %c0_2] : memref<1x128xf32, #tpu.memory_space<vmem>>, vector<1x128xf32>
    %c0_3 = arith.constant 0 : index
    %c0_4 = arith.constant 0 : index
    %c0_5 = arith.constant 0 : index
    %c0_6 = arith.constant 0 : index
    %2 = vector.load %arg2[%c0_3, %c0_4, %c0_5, %c0_6] : memref<1x4x64x256xbf16, #tpu.memory_space<vmem>>, vector<1x4x64x256xbf16>
    %3 = vector.shape_cast %2 : vector<1x4x64x256xbf16> to vector<256x256xbf16>
    %cst = arith.constant dense<0.000000e+00> : vector<256x128xf32>
    %4 = tpu.matmul %3, %0, %cst {dimension_numbers = #tpu.dot_dimension_numbers<[1], [0], [0], [1], [0, 0, 1, 1], [], []>} : vector<256x256xbf16>, vector<256x128xbf16>, vector<256x128xf32> -> vector<256x128xf32>
    %5 = vector.broadcast %1 : vector<1x128xf32> to vector<256x128xf32>
    %6 = arith.addf %4, %5 : vector<256x128xf32>
    %cst_7 = arith.constant 0.000000e+00 : f32
    %7 = vector.broadcast %cst_7 : f32 to vector<256x128xf32>
    %8 = arith.maximumf %6, %7 : vector<256x128xf32>
    %9 = vector.shape_cast %8 : vector<256x128xf32> to vector<4x64x128xf32>
    %c0_8 = arith.constant 0 : index
    %c0_9 = arith.constant 0 : index
    %c0_10 = arith.constant 0 : index
    %c0_11 = arith.constant 0 : index
    %10 = vector.load %arg3[%c0_8, %c0_9, %c0_10, %c0_11] : memref<1x1x64x256xbf16, #tpu.memory_space<vmem>>, vector<1x1x64x256xbf16>
    %11 = vector.shape_cast %10 : vector<1x1x64x256xbf16> to vector<64x256xbf16>
    %cst_12 = arith.constant dense<0.000000e+00> : vector<64x128xf32>
    %12 = tpu.matmul %11, %0, %cst_12 {dimension_numbers = #tpu.dot_dimension_numbers<[1], [0], [0], [1], [0, 0, 1, 1], [], []>} : vector<64x256xbf16>, vector<256x128xbf16>, vector<64x128xf32> -> vector<64x128xf32>
    %13 = vector.broadcast %1 : vector<1x128xf32> to vector<64x128xf32>
    %14 = arith.addf %12, %13 : vector<64x128xf32>
    %cst_13 = arith.constant 0.000000e+00 : f32
    %15 = vector.broadcast %cst_13 : f32 to vector<64x128xf32>
    %16 = arith.maximumf %14, %15 : vector<64x128xf32>
    %c0_14 = arith.constant 0 : index
    %c0_15 = arith.constant 0 : index
    %c0_16 = arith.constant 0 : index
    %c0_17 = arith.constant 0 : index
    %17 = vector.load %arg4[%c0_14, %c0_15, %c0_16, %c0_17] : memref<1x1x64x256xbf16, #tpu.memory_space<vmem>>, vector<1x1x64x256xbf16>
    %18 = vector.shape_cast %17 : vector<1x1x64x256xbf16> to vector<64x256xbf16>
    %cst_18 = arith.constant dense<0.000000e+00> : vector<64x128xf32>
    %19 = tpu.matmul %18, %0, %cst_18 {dimension_numbers = #tpu.dot_dimension_numbers<[1], [0], [0], [1], [0, 0, 1, 1], [], []>} : vector<64x256xbf16>, vector<256x128xbf16>, vector<64x128xf32> -> vector<64x128xf32>
    %20 = vector.broadcast %1 : vector<1x128xf32> to vector<64x128xf32>
    %21 = arith.addf %19, %20 : vector<64x128xf32>
    %cst_19 = arith.constant 0.000000e+00 : f32
    %22 = vector.broadcast %cst_19 : f32 to vector<64x128xf32>
    %23 = arith.maximumf %21, %22 : vector<64x128xf32>
    %24 = vector.extract_strided_slice %9 {offsets = [0, 0, 0], sizes = [1, 64, 128], strides = [1, 1, 1]} : vector<4x64x128xf32> to vector<1x64x128xf32>
    %25 = vector.shape_cast %24 : vector<1x64x128xf32> to vector<64x128xf32>
    %26 = vector.extract_strided_slice %9 {offsets = [1, 0, 0], sizes = [1, 64, 128], strides = [1, 1, 1]} : vector<4x64x128xf32> to vector<1x64x128xf32>
    %27 = vector.shape_cast %26 : vector<1x64x128xf32> to vector<64x128xf32>
    %cst_20 = arith.constant 7.500000e-01 : f32
    %28 = vector.broadcast %cst_20 : f32 to vector<64x128xf32>
    %29 = arith.mulf %28, %25 : vector<64x128xf32>
    %cst_21 = arith.constant 2.500000e-01 : f32
    %30 = vector.broadcast %cst_21 : f32 to vector<64x128xf32>
    %31 = arith.mulf %30, %16 : vector<64x128xf32>
    %32 = arith.addf %29, %31 : vector<64x128xf32>
    %33 = arith.truncf %32 : vector<64x128xf32> to vector<64x128xbf16>
    %cst_22 = arith.constant 7.500000e-01 : f32
    %34 = vector.broadcast %cst_22 : f32 to vector<64x128xf32>
    %35 = arith.mulf %34, %25 : vector<64x128xf32>
    %cst_23 = arith.constant 2.500000e-01 : f32
    %36 = vector.broadcast %cst_23 : f32 to vector<64x128xf32>
    %37 = arith.mulf %36, %27 : vector<64x128xf32>
    %38 = arith.addf %35, %37 : vector<64x128xf32>
    %39 = arith.truncf %38 : vector<64x128xf32> to vector<64x128xbf16>
    %40 = vector.extract_strided_slice %9 {offsets = [1, 0, 0], sizes = [1, 64, 128], strides = [1, 1, 1]} : vector<4x64x128xf32> to vector<1x64x128xf32>
    %41 = vector.shape_cast %40 : vector<1x64x128xf32> to vector<64x128xf32>
    %42 = vector.extract_strided_slice %9 {offsets = [0, 0, 0], sizes = [1, 64, 128], strides = [1, 1, 1]} : vector<4x64x128xf32> to vector<1x64x128xf32>
    %43 = vector.shape_cast %42 : vector<1x64x128xf32> to vector<64x128xf32>
    %44 = vector.extract_strided_slice %9 {offsets = [2, 0, 0], sizes = [1, 64, 128], strides = [1, 1, 1]} : vector<4x64x128xf32> to vector<1x64x128xf32>
    %45 = vector.shape_cast %44 : vector<1x64x128xf32> to vector<64x128xf32>
    %cst_24 = arith.constant 7.500000e-01 : f32
    %46 = vector.broadcast %cst_24 : f32 to vector<64x128xf32>
    %47 = arith.mulf %46, %41 : vector<64x128xf32>
    %cst_25 = arith.constant 2.500000e-01 : f32
    %48 = vector.broadcast %cst_25 : f32 to vector<64x128xf32>
    %49 = arith.mulf %48, %43 : vector<64x128xf32>
    %50 = arith.addf %47, %49 : vector<64x128xf32>
    %51 = arith.truncf %50 : vector<64x128xf32> to vector<64x128xbf16>
    %cst_26 = arith.constant 7.500000e-01 : f32
    %52 = vector.broadcast %cst_26 : f32 to vector<64x128xf32>
    %53 = arith.mulf %52, %41 : vector<64x128xf32>
    %cst_27 = arith.constant 2.500000e-01 : f32
    %54 = vector.broadcast %cst_27 : f32 to vector<64x128xf32>
    %55 = arith.mulf %54, %45 : vector<64x128xf32>
    %56 = arith.addf %53, %55 : vector<64x128xf32>
    %57 = arith.truncf %56 : vector<64x128xf32> to vector<64x128xbf16>
    %58 = vector.extract_strided_slice %9 {offsets = [2, 0, 0], sizes = [1, 64, 128], strides = [1, 1, 1]} : vector<4x64x128xf32> to vector<1x64x128xf32>
    %59 = vector.shape_cast %58 : vector<1x64x128xf32> to vector<64x128xf32>
    %60 = vector.extract_strided_slice %9 {offsets = [1, 0, 0], sizes = [1, 64, 128], strides = [1, 1, 1]} : vector<4x64x128xf32> to vector<1x64x128xf32>
    %61 = vector.shape_cast %60 : vector<1x64x128xf32> to vector<64x128xf32>
    %62 = vector.extract_strided_slice %9 {offsets = [3, 0, 0], sizes = [1, 64, 128], strides = [1, 1, 1]} : vector<4x64x128xf32> to vector<1x64x128xf32>
    %63 = vector.shape_cast %62 : vector<1x64x128xf32> to vector<64x128xf32>
    %cst_28 = arith.constant 7.500000e-01 : f32
    %64 = vector.broadcast %cst_28 : f32 to vector<64x128xf32>
    %65 = arith.mulf %64, %59 : vector<64x128xf32>
    %cst_29 = arith.constant 2.500000e-01 : f32
    %66 = vector.broadcast %cst_29 : f32 to vector<64x128xf32>
    %67 = arith.mulf %66, %61 : vector<64x128xf32>
    %68 = arith.addf %65, %67 : vector<64x128xf32>
    %69 = arith.truncf %68 : vector<64x128xf32> to vector<64x128xbf16>
    %cst_30 = arith.constant 7.500000e-01 : f32
    %70 = vector.broadcast %cst_30 : f32 to vector<64x128xf32>
    %71 = arith.mulf %70, %59 : vector<64x128xf32>
    %cst_31 = arith.constant 2.500000e-01 : f32
    %72 = vector.broadcast %cst_31 : f32 to vector<64x128xf32>
    %73 = arith.mulf %72, %63 : vector<64x128xf32>
    %74 = arith.addf %71, %73 : vector<64x128xf32>
    %75 = arith.truncf %74 : vector<64x128xf32> to vector<64x128xbf16>
    %76 = vector.extract_strided_slice %9 {offsets = [3, 0, 0], sizes = [1, 64, 128], strides = [1, 1, 1]} : vector<4x64x128xf32> to vector<1x64x128xf32>
    %77 = vector.shape_cast %76 : vector<1x64x128xf32> to vector<64x128xf32>
    %78 = vector.extract_strided_slice %9 {offsets = [2, 0, 0], sizes = [1, 64, 128], strides = [1, 1, 1]} : vector<4x64x128xf32> to vector<1x64x128xf32>
    %79 = vector.shape_cast %78 : vector<1x64x128xf32> to vector<64x128xf32>
    %cst_32 = arith.constant 7.500000e-01 : f32
    %80 = vector.broadcast %cst_32 : f32 to vector<64x128xf32>
    %81 = arith.mulf %80, %77 : vector<64x128xf32>
    %cst_33 = arith.constant 2.500000e-01 : f32
    %82 = vector.broadcast %cst_33 : f32 to vector<64x128xf32>
    %83 = arith.mulf %82, %79 : vector<64x128xf32>
    %84 = arith.addf %81, %83 : vector<64x128xf32>
    %85 = arith.truncf %84 : vector<64x128xf32> to vector<64x128xbf16>
    %cst_34 = arith.constant 7.500000e-01 : f32
    %86 = vector.broadcast %cst_34 : f32 to vector<64x128xf32>
    %87 = arith.mulf %86, %77 : vector<64x128xf32>
    %cst_35 = arith.constant 2.500000e-01 : f32
    %88 = vector.broadcast %cst_35 : f32 to vector<64x128xf32>
    %89 = arith.mulf %88, %23 : vector<64x128xf32>
    %90 = arith.addf %87, %89 : vector<64x128xf32>
    %91 = arith.truncf %90 : vector<64x128xf32> to vector<64x128xbf16>
    %92 = tpu.concatenate %33, %39, %51, %57, %69, %75, %85, %91 in 1 : vector<64x128xbf16>, vector<64x128xbf16>, vector<64x128xbf16>, vector<64x128xbf16>, vector<64x128xbf16>, vector<64x128xbf16>, vector<64x128xbf16>, vector<64x128xbf16> -> vector<64x1024xbf16>
    %c0_36 = arith.constant 0 : index
    %c0_37 = arith.constant 0 : index
    %93 = vector.load %arg7[%c0_36, %c0_37] : memref<256x64xbf16, #tpu.memory_space<vmem>>, vector<256x64xbf16>
    %cst_38 = arith.constant dense<0.000000e+00> : vector<256x1024xf32>
    %94 = tpu.matmul %93, %92, %cst_38 {dimension_numbers = #tpu.dot_dimension_numbers<[1], [0], [0], [1], [0, 0, 1, 1], [], []>} : vector<256x64xbf16>, vector<64x1024xbf16>, vector<256x1024xf32> -> vector<256x1024xf32>
    %95 = vector.extract_strided_slice %94 {offsets = [0, 0], sizes = [256, 128], strides = [1, 1]} : vector<256x1024xf32> to vector<256x128xf32>
    %96 = arith.truncf %95 : vector<256x128xf32> to vector<256x128xbf16>
    %c0_39 = arith.constant 0 : index
    %c0_40 = arith.constant 0 : index
    %c0_41 = arith.constant 0 : index
    %c0_42 = arith.constant 0 : index
    %97 = vector.load %arg8[%c0_39, %c0_40, %c0_41, %c0_42] : memref<1x8x256x128xbf16, #tpu.memory_space<vmem>>, vector<1x1x256x128xbf16>
    %98 = vector.shape_cast %97 : vector<1x1x256x128xbf16> to vector<256x128xbf16>
    %99 = vector.shape_cast %96 : vector<256x128xbf16> to vector<1x1x256x128xbf16>
    tpu.vector_store %arg8[%c0_39, %c0_40, %c0_41, %c0_42], %99 {strides = array<i32>} : memref<1x8x256x128xbf16, #tpu.memory_space<vmem>>, vector<1x1x256x128xbf16>,
    %100 = vector.extract_strided_slice %94 {offsets = [0, 128], sizes = [256, 128], strides = [1, 1]} : vector<256x1024xf32> to vector<256x128xf32>
    %101 = arith.truncf %100 : vector<256x128xf32> to vector<256x128xbf16>
    %c0_43 = arith.constant 0 : index
    %c1 = arith.constant 1 : index
    %c0_44 = arith.constant 0 : index
    %c0_45 = arith.constant 0 : index
    %102 = vector.load %arg8[%c0_43, %c1, %c0_44, %c0_45] : memref<1x8x256x128xbf16, #tpu.memory_space<vmem>>, vector<1x1x256x128xbf16>
    %103 = vector.shape_cast %102 : vector<1x1x256x128xbf16> to vector<256x128xbf16>
    %104 = vector.shape_cast %101 : vector<256x128xbf16> to vector<1x1x256x128xbf16>
    tpu.vector_store %arg8[%c0_43, %c1, %c0_44, %c0_45], %104 {strides = array<i32>} : memref<1x8x256x128xbf16, #tpu.memory_space<vmem>>, vector<1x1x256x128xbf16>,
    %105 = vector.extract_strided_slice %94 {offsets = [0, 256], sizes = [256, 128], strides = [1, 1]} : vector<256x1024xf32> to vector<256x128xf32>
    %106 = arith.truncf %105 : vector<256x128xf32> to vector<256x128xbf16>
    %c0_46 = arith.constant 0 : index
    %c2 = arith.constant 2 : index
    %c0_47 = arith.constant 0 : index
    %c0_48 = arith.constant 0 : index
    %107 = vector.load %arg8[%c0_46, %c2, %c0_47, %c0_48] : memref<1x8x256x128xbf16, #tpu.memory_space<vmem>>, vector<1x1x256x128xbf16>
    %108 = vector.shape_cast %107 : vector<1x1x256x128xbf16> to vector<256x128xbf16>
    %109 = vector.shape_cast %106 : vector<256x128xbf16> to vector<1x1x256x128xbf16>
    tpu.vector_store %arg8[%c0_46, %c2, %c0_47, %c0_48], %109 {strides = array<i32>} : memref<1x8x256x128xbf16, #tpu.memory_space<vmem>>, vector<1x1x256x128xbf16>,
    %110 = vector.extract_strided_slice %94 {offsets = [0, 384], sizes = [256, 128], strides = [1, 1]} : vector<256x1024xf32> to vector<256x128xf32>
    %111 = arith.truncf %110 : vector<256x128xf32> to vector<256x128xbf16>
    %c0_49 = arith.constant 0 : index
    %c3 = arith.constant 3 : index
    %c0_50 = arith.constant 0 : index
    %c0_51 = arith.constant 0 : index
    %112 = vector.load %arg8[%c0_49, %c3, %c0_50, %c0_51] : memref<1x8x256x128xbf16, #tpu.memory_space<vmem>>, vector<1x1x256x128xbf16>
    %113 = vector.shape_cast %112 : vector<1x1x256x128xbf16> to vector<256x128xbf16>
    %114 = vector.shape_cast %111 : vector<256x128xbf16> to vector<1x1x256x128xbf16>
    tpu.vector_store %arg8[%c0_49, %c3, %c0_50, %c0_51], %114 {strides = array<i32>} : memref<1x8x256x128xbf16, #tpu.memory_space<vmem>>, vector<1x1x256x128xbf16>,
    %115 = vector.extract_strided_slice %94 {offsets = [0, 512], sizes = [256, 128], strides = [1, 1]} : vector<256x1024xf32> to vector<256x128xf32>
    %116 = arith.truncf %115 : vector<256x128xf32> to vector<256x128xbf16>
    %c0_52 = arith.constant 0 : index
    %c4 = arith.constant 4 : index
    %c0_53 = arith.constant 0 : index
    %c0_54 = arith.constant 0 : index
    %117 = vector.load %arg8[%c0_52, %c4, %c0_53, %c0_54] : memref<1x8x256x128xbf16, #tpu.memory_space<vmem>>, vector<1x1x256x128xbf16>
    %118 = vector.shape_cast %117 : vector<1x1x256x128xbf16> to vector<256x128xbf16>
    %119 = vector.shape_cast %116 : vector<256x128xbf16> to vector<1x1x256x128xbf16>
    tpu.vector_store %arg8[%c0_52, %c4, %c0_53, %c0_54], %119 {strides = array<i32>} : memref<1x8x256x128xbf16, #tpu.memory_space<vmem>>, vector<1x1x256x128xbf16>,
    %120 = vector.extract_strided_slice %94 {offsets = [0, 640], sizes = [256, 128], strides = [1, 1]} : vector<256x1024xf32> to vector<256x128xf32>
    %121 = arith.truncf %120 : vector<256x128xf32> to vector<256x128xbf16>
    %c0_55 = arith.constant 0 : index
    %c5 = arith.constant 5 : index
    %c0_56 = arith.constant 0 : index
    %c0_57 = arith.constant 0 : index
    %122 = vector.load %arg8[%c0_55, %c5, %c0_56, %c0_57] : memref<1x8x256x128xbf16, #tpu.memory_space<vmem>>, vector<1x1x256x128xbf16>
    %123 = vector.shape_cast %122 : vector<1x1x256x128xbf16> to vector<256x128xbf16>
    %124 = vector.shape_cast %121 : vector<256x128xbf16> to vector<1x1x256x128xbf16>
    tpu.vector_store %arg8[%c0_55, %c5, %c0_56, %c0_57], %124 {strides = array<i32>} : memref<1x8x256x128xbf16, #tpu.memory_space<vmem>>, vector<1x1x256x128xbf16>,
    %125 = vector.extract_strided_slice %94 {offsets = [0, 768], sizes = [256, 128], strides = [1, 1]} : vector<256x1024xf32> to vector<256x128xf32>
    %126 = arith.truncf %125 : vector<256x128xf32> to vector<256x128xbf16>
    %c0_58 = arith.constant 0 : index
    %c6 = arith.constant 6 : index
    %c0_59 = arith.constant 0 : index
    %c0_60 = arith.constant 0 : index
    %127 = vector.load %arg8[%c0_58, %c6, %c0_59, %c0_60] : memref<1x8x256x128xbf16, #tpu.memory_space<vmem>>, vector<1x1x256x128xbf16>
    %128 = vector.shape_cast %127 : vector<1x1x256x128xbf16> to vector<256x128xbf16>
    %129 = vector.shape_cast %126 : vector<256x128xbf16> to vector<1x1x256x128xbf16>
    tpu.vector_store %arg8[%c0_58, %c6, %c0_59, %c0_60], %129 {strides = array<i32>} : memref<1x8x256x128xbf16, #tpu.memory_space<vmem>>, vector<1x1x256x128xbf16>,
    %130 = vector.extract_strided_slice %94 {offsets = [0, 896], sizes = [256, 128], strides = [1, 1]} : vector<256x1024xf32> to vector<256x128xf32>
    %131 = arith.truncf %130 : vector<256x128xf32> to vector<256x128xbf16>
    %c0_61 = arith.constant 0 : index
    %c7 = arith.constant 7 : index
    %c0_62 = arith.constant 0 : index
    %c0_63 = arith.constant 0 : index
    %132 = vector.load %arg8[%c0_61, %c7, %c0_62, %c0_63] : memref<1x8x256x128xbf16, #tpu.memory_space<vmem>>, vector<1x1x256x128xbf16>
    %133 = vector.shape_cast %132 : vector<1x1x256x128xbf16> to vector<256x128xbf16>
    %134 = vector.shape_cast %131 : vector<256x128xbf16> to vector<1x1x256x128xbf16>
    tpu.vector_store %arg8[%c0_61, %c7, %c0_62, %c0_63], %134 {strides = array<i32>} : memref<1x8x256x128xbf16, #tpu.memory_space<vmem>>, vector<1x1x256x128xbf16>,
    return
  }
  func.func @transform_0(%arg0: i32, %arg1: i32) -> (i32, i32, i32, i32) {
    %c0_i32 = arith.constant 0 : i32
    %c0_i32_0 = arith.constant 0 : i32
    %c0_i32_1 = arith.constant 0 : i32
    return %arg0, %arg1, %c0_i32, %c0_i32_0 : i32, i32, i32, i32
  }
  func.func @transform_1(%arg0: i32, %arg1: i32) -> (i32, i32, i32, i32) {
    %c4_i32 = arith.constant 4 : i32
    %0 = arith.muli %arg1, %c4_i32 : i32
    %c1_i32 = arith.constant 1 : i32
    %1 = arith.subi %0, %c1_i32 : i32
    %c0_i32 = arith.constant 0 : i32
    %2 = arith.maxsi %1, %c0_i32 : i32
    %c0_i32_0 = arith.constant 0 : i32
    %c0_i32_1 = arith.constant 0 : i32
    %c0_i32_2 = arith.constant 0 : i32
    return %arg0, %2, %c0_i32_0, %c0_i32_1 : i32, i32, i32, i32
  }
  func.func @transform_2(%arg0: i32, %arg1: i32) -> (i32, i32, i32, i32) {
    %c4_i32 = arith.constant 4 : i32
    %0 = arith.muli %arg1, %c4_i32 : i32
    %c4_i32_0 = arith.constant 4 : i32
    %1 = arith.addi %0, %c4_i32_0 : i32
    %c7_i32 = arith.constant 7 : i32
    %2 = arith.minsi %1, %c7_i32 : i32
    %c0_i32 = arith.constant 0 : i32
    %c0_i32_1 = arith.constant 0 : i32
    %c0_i32_2 = arith.constant 0 : i32
    return %arg0, %2, %c0_i32, %c0_i32_1 : i32, i32, i32, i32
  }
  func.func @transform_3(%arg0: i32, %arg1: i32) -> (i32, i32) {
    %c0_i32 = arith.constant 0 : i32
    %c0_i32_0 = arith.constant 0 : i32
    %c0_i32_1 = arith.constant 0 : i32
    return %c0_i32, %c0_i32_0 : i32, i32
  }
  func.func @transform_4(%arg0: i32, %arg1: i32) -> (i32, i32) {
    %c0_i32 = arith.constant 0 : i32
    %c0_i32_0 = arith.constant 0 : i32
    %c0_i32_1 = arith.constant 0 : i32
    return %c0_i32, %c0_i32_0 : i32, i32
  }
  func.func @transform_5(%arg0: i32, %arg1: i32) -> (i32, i32) {
    %c0_i32 = arith.constant 0 : i32
    %c0_i32_0 = arith.constant 0 : i32
    %c0_i32_1 = arith.constant 0 : i32
    return %c0_i32, %c0_i32_0 : i32, i32
  }
  func.func @transform_6(%arg0: i32, %arg1: i32) -> (i32, i32, i32, i32) {
    %c0_i32 = arith.constant 0 : i32
    %c0_i32_0 = arith.constant 0 : i32
    %c0_i32_1 = arith.constant 0 : i32
    return %arg0, %arg1, %c0_i32, %c0_i32_0 : i32, i32, i32, i32
  }
}

</mosaic_0001>

<bundles_post_ra>
// kernel: unet_block_up.1
= control target key start
LH: loop header
LB: loop body
LE: loop exit
PB: predicated region body
PF: predicated region fallthrough
CT: control target
= control target key end

     0   :  { %s6369_s0 = inlined_call_operand.vmem [shape: bf16[2,8,64,256], index: 0, kind: input, shape index: {}, may-alias: {0,1,2}]   ;;  %s6370_s1 = inlined_call_operand.vmem [shape: bf16[2,8,64,256], index: 1, kind: input, shape index: {}, may-alias: {0,1,2}]   ;;  %s6371_s2 = inlined_call_operand.vmem [shape: bf16[2,8,64,256], index: 2, kind: input, shape index: {}, may-alias: {0,1,2}]   ;;  %s6372_s3 = inlined_call_operand.vmem [shape: bf16[256,128], index: 3, kind: input, shape index: {}]   ;;  %s6373_s4 = inlined_call_operand.vmem [shape: f32[1,128], index: 4, kind: input, shape index: {}]   ;;  %s6374_s5 = inlined_call_operand.hbm [shape: bf16[256,64], index: 5, kind: input, shape index: {}]   ;;  %s6375_s6 = inlined_call_operand.hbm [shape: bf16[2,16,256,128], index: 6, kind: output, shape index: {}]  }
   0x1   :  { %6396 = sst [smem:[#allocation25_spill]] %s6374_s5 }
   0x2   :  { %11 = vsyncpa [#allocation3], 0 }
   0x3   :  { %12 = vsyncpa [#allocation4], 0 }
   0x4   :  { %14 = vsyncpa [#allocation4 + $0x1], 0  ;;  %s4976_s21 = smov 0   ;;  %s4978_s22 = smov 0  }
   0x5   :  { %s4980_s23 = smov 0   ;;  %s4982_s24 = smov 0  }
   0x6   :  { %s4984_s25 = smov 0   ;;  %s4986_s26 = smov 0  }
   0x7   :  { %s4988_s27 = smov 0   ;;  %s4990_s28 = smov 0  }
   0x8 LB: > { %s3138_s29 = sadd.s32 4294967295, %s4934_s28   ;;  %s3139_s30 = sadd.s32 4294967294, %s4934_s28   ;;  %s4934_s28 = sphi %s4990_s28, %s20_s28   ;;  %s4930_s27 = sphi %s4988_s27, %s6476_s27   ;;  %s4926_s26 = sphi %s4986_s26, %s6475_s26   ;;  %s4922_s25 = sphi %s4984_s25, %s6474_s25   ;;  %s4918_s24 = sphi %s4982_s24, %s6473_s24   ;;  %s4914_s23 = sphi %s4980_s23, %s6472_s23   ;;  %s4910_s22 = sphi %s4978_s22, %s6471_s22   ;;  %s4906_s21 = sphi %s4976_s21, %s6470_s21  }
   0x9   : > { %s29_s7 = sadd.s32 1, %s4926_s26  ;;  %s32_s8 = sadd.s32 1, %s4930_s27 }
   0xa   : > { %p30_p0 = scmp.ge.s32.totalorder %s29_s7, 2  ;;  %s204_s9 = sadd.s32 1, %s4914_s23 }
   0xb   : > { %p214_p1 = scmp.ne.s32.totalorder %s4914_s23, %s4910_s22  ;;  %p215_p2 = scmp.eq.s32.totalorder %s3138_s29, 3 }
   0xc   : > { %s6478_s7 = smov (%p30_p0, %s29_s7), 0  ;;  %s6480_s8 = smov (!%p30_p0, %s32_s8), %s4930_s27 }
   0xd   : > { %s200_s10 = ssub.s32 %s4926_s26, %s6478_s7  ;;  %p5028_p3 = por %p215_p2, %p214_p1 }
   0xe   : > { %p34_p4 = scmp.ge.s32.totalorder %s6480_s8, 2  ;;  %p220_p5 = scmp.ne.s32.totalorder %s4910_s22, %s4906_s21 }
   0xf   : > { %p221_p6 = scmp.eq.s32.totalorder %s3139_s30, 3  ;;  %p3146_p7 = scmp.ge.s32.totalorder %s4934_s28, 1 }
  0x10   : > { %s6482_s8 = smov (%p34_p4, %s6480_s8), 0  ;;  %p228_p9 = scmp.lt.s32.totalorder %s4934_s28, 5 }
  0x11   : > { %p5037_p8 = por %p221_p6, %p220_p5  ;;  %s199_s13 = ssub.s32 %s4930_s27, %s6482_s8 }
  0x12   : > { %s201_s14 = sor.u32 %s200_s10, %s199_s13  ;;  %p5044_p10 = pnand %p3146_p7, %p228_p9 }
  0x13   : > { %p202_p11 = scmp.eq.s32.totalorder %s201_s14, 0  ;;  %p5048_p12 = scmp.eq.s32.totalorder %s3138_s29, 0 }
  0x14   : > { %p4724_p13 = pneg %p5044_p10  ;;  %s6401_s5 = sld [smem:[#allocation25_spill]] }
  0x15   : > { %s5058_s20 = scalar_select %p202_p11, %s4914_s23, %s204_s9  }
  0x16   : > { %s4936_s30 = smov [#allocation2]   ;;  %p4725_p0 = pnand %p5048_p12, %p4724_p13 }
  0x17   : > { %s247_s10 = sshll.u32 %s4936_s30, 4  ;;  %s4937_s13 = smov 64   ;;  %s248_s10 = int_to_ptr.vmem [resolvable:$true] %s247_s10 }
  0x18   : > { %s4938_s29 = smov 4   ;;  %317 = sbr.rel (%p5044_p10) target bundleno = 1043 (0x413), region = 44 }
  0x1a   : > { %s245_s19 = sshll.u32 %s6401_s5, 4  ;;  %s246_s19 = int_to_ptr.hbm [resolvable:$true] %s245_s19 }
  0x1b   : > { %4727 = dma.hbm_to_vmem [thread:$0]  (!%p4725_p0), %s246_s19, 2048, %s248_s10, [#allocation3], %s4937_s13, %s4937_s13, %s4938_s29  }
  0x1d   : > { %4897 = dma.done.wait (%p5048_p12), [#allocation3], 2048  }
  0x1e   : > { %4899 = vsyncadd (%p5048_p12), [#allocation3], 4294965248  ;;  %v5071_v0 = vld [vmem:[%s6372_s3 + $0x38] sm:$0xff]  ;;  %s5079_s15 = sshll.u32 %s4918_s24, 2  ;;  %v5086_v2 = vld [vmem:[%s6372_s3 + $0x30] sm:$0xff]  ;;  %p380_p1 = scmp.lt.s32.totalorder %s4922_s25, 1 }
  0x1f   : > { %v5076_v1 = vld [vmem:[%s6372_s3 + $0x78] sm:$0xff]  ;;  %750 = vmatpush.bf16.msra.mxu0 %v5071_v0  ;;  %4702 = vmatpush.bf16.msra.mxu2 %v5071_v0  ;;  %v5093_v3 = vld [vmem:[%s6372_s3 + $0x70] sm:$0xff]  ;;  %p382_p2 = scmp.lt.s32.totalorder %s5079_s15, 7  ;;  %v5102_v4 = vld [vmem:[%s6372_s3 + $0x28] sm:$0xff]  ;;  %vm1700_vm0 = vcmask 523264  }
  0x20   : > { %839 = vmatpush.bf16.msra.mxu1 %v5076_v1  ;;  %4710 = vmatpush.bf16.msra.mxu3 %v5076_v1  ;;  %v5109_v5 = vld [vmem:[%s6372_s3 + $0x68] sm:$0xff]  ;;  %s381_s17 = scalar_select %p380_p1, %s4922_s25, 1  ;;  %v5118_v6 = vld [vmem:[%s6372_s3 + $0x20] sm:$0xff]  ;;  %v5134_v8 = vld [vmem:[%s6372_s3 + $0x18] sm:$0xff] }
  0x21   : > { %s383_s18 = scalar_select %p382_p2, %s5079_s15, 7  ;;  %v5125_v7 = vld [vmem:[%s6372_s3 + $0x60] sm:$0xff]  ;;  %v5141_v9 = vld [vmem:[%s6372_s3 + $0x58] sm:$0xff]  ;;  %v5149_v10 = vld [vmem:[%s6372_s3 + $0x10] sm:$0xff] }
  0x22   : > { %s5127_s29 = sshll.u32 %s381_s17, 7  ;;  %v5156_v11 = vld [vmem:[%s6372_s3 + $0x50] sm:$0xff]  ;;  %v5173_v12 = vld [vmem:[%s6372_s3 + $0x8] sm:$0xff]  ;;  %v5188_v15 = vld [vmem:[%s6372_s3] sm:$0xff] }
  0x23   : > { %751 = vmatpush.bf16.msra.mxu0 %v5086_v2  ;;  %4703 = vmatpush.bf16.msra.mxu2 %v5086_v2  ;;  %s3153_s13 = sshll.u32 %s383_s18, 4  ;;  %v5180_v13 = vld [vmem:[%s6372_s3 + $0x48] sm:$0xff]  ;;  %v5204_v21 = vld [vmem:[%s6372_s3 + $0x40] sm:$0xff] }
  0x24   : > { %840 = vmatpush.bf16.msra.mxu1 %v5093_v3  ;;  %4711 = vmatpush.bf16.msra.mxu3 %v5093_v3  ;;  %s386_s17 = sadd.s32 %s5127_s29, %s3153_s13  ;;  %s408_s13 = sadd.s32 4, %s5079_s15 }
  0x25   : > { %s3155_s10 = sshll.u32 %s386_s17, 2  ;;  %p5164_p4 = scmp.lt.s32.totalorder %s408_s13, 7 }
  0x26   : > { %s5162_s5 = scalar_lea.vmem %s6369_s0, %s3155_s10 }
  0x27   : > { %752 = vmatpush.bf16.msra.mxu0 %v5102_v4  ;;  %4704 = vmatpush.bf16.msra.mxu2 %v5102_v4  ;;  %s6484_s13 = smov (!%p5164_p4, %s408_s13), 7  ;;  %v3175_v14 = vld [vmem:[%s5162_s5] sm:$0xf]  ;;  %v3871_v16 = vld [vmem:[%s5162_s5 + $0x4] sm:$0xf0] }
  0x28   : > { %841 = vmatpush.bf16.msra.mxu1 %v5109_v5  ;;  %4712 = vmatpush.bf16.msra.mxu3 %v5109_v5  ;;  %v3271_v17 = vld [vmem:[%s5162_s5 + $0xc0] sm:$0xf]  ;;  %s6486_s13 = smov (!%p5164_p4, %s6484_s13), 7  ;;  %v3895_v18 = vld [vmem:[%s5162_s5 + $0xc4] sm:$0xf0]  ;;  %v3176_v24 = vor.u32 %v3871_v16, %v3175_v14 }
  0x29   : > { %v3870_v19 = vld [vmem:[%s5162_s5 + $0x4] sm:$0xf]  ;;  %v3177_v20 = vld [vmem:[%s5162_s5 + $0x8] sm:$0xf0]  ;;  %s5208_s17 = sshll.u32 %s6486_s13, 4  ;;  %v3272_v25 = vor.u32 %v3895_v18, %v3271_v17  ;;  %s3157_s13 = sadd.s32 4294967295, %s5079_s15 }
  0x2a   : > { %v3894_v22 = vld [vmem:[%s5162_s5 + $0xc4] sm:$0xf]  ;;  %v3273_v23 = vld [vmem:[%s5162_s5 + $0xc8] sm:$0xf0]  ;;  %s417_s30 = sadd.s32 %s5208_s17, %s5127_s29  ;;  %v3180_v26 = vor.u32 %v3870_v19, %v3177_v20  ;;  %v3183_v28 = vld [vmem:[%s5162_s5 + $0x10] sm:$0xf] }
  0x2b   : > { %753 = vmatpush.bf16.msra.mxu0 %v5118_v6  ;;  %4705 = vmatpush.bf16.msra.mxu2 %v5118_v6  ;;  %v3276_v27 = vor.u32 %v3894_v22, %v3273_v23  ;;  %v3873_v29 = vld [vmem:[%s5162_s5 + $0x14] sm:$0xf0]  ;;  %v3279_v30 = vld [vmem:[%s5162_s5 + $0xd0] sm:$0xf]  ;;  %v3872_v32 = vld [vmem:[%s5162_s5 + $0x14] sm:$0xf] }
  0x2c   : > { %842 = vmatpush.bf16.msra.mxu1 %v5125_v7  ;;  %4713 = vmatpush.bf16.msra.mxu3 %v5125_v7  ;;  %v3897_v31 = vld [vmem:[%s5162_s5 + $0xd4] sm:$0xf0]  ;;  %v3185_v33 = vld [vmem:[%s5162_s5 + $0x18] sm:$0xf0]  ;;  %v3896_v34 = vld [vmem:[%s5162_s5 + $0xd4] sm:$0xf]  ;;  %v3184_v36 = vor.u32 %v3873_v29, %v3183_v28 }
  0x2d   : > { %v3281_v35 = vld [vmem:[%s5162_s5 + $0xd8] sm:$0xf0]  ;;  %v3280_v37 = vor.u32 %v3897_v31, %v3279_v30  ;;  %v3188_v38 = vor.u32 %v3872_v32, %v3185_v33  ;;  %v3191_v40 = vld [vmem:[%s5162_s5 + $0x20] sm:$0xf]  ;;  %v3875_v41 = vld [vmem:[%s5162_s5 + $0x24] sm:$0xf0] }
  0x2e   : > { %v3284_v39 = vor.u32 %v3896_v34, %v3281_v35  ;;  %v3287_v42 = vld [vmem:[%s5162_s5 + $0xe0] sm:$0xf]  ;;  %v3899_v43 = vld [vmem:[%s5162_s5 + $0xe4] sm:$0xf0]  ;;  %v3874_v44 = vld [vmem:[%s5162_s5 + $0x24] sm:$0xf]  ;;  %v3192_v48 = vor.u32 %v3875_v41, %v3191_v40 }
  0x2f   : > { %754 = vmatpush.bf16.msra.mxu0 %v5134_v8  ;;  %4706 = vmatpush.bf16.msra.mxu2 %v5134_v8  ;;  %v3193_v45 = vld [vmem:[%s5162_s5 + $0x28] sm:$0xf0]  ;;  %v3898_v46 = vld [vmem:[%s5162_s5 + $0xe4] sm:$0xf]  ;;  %v3288_v49 = vor.u32 %v3899_v43, %v3287_v42  ;;  %p392_p5 = scmp.gt.s32.totalorder %s3157_s13, 0  ;;  %p3158_p6 = scmp.lt.s32.totalorder %s3157_s13, 7 }
  0x30   : > { %843 = vmatpush.bf16.msra.mxu1 %v5141_v9  ;;  %4714 = vmatpush.bf16.msra.mxu3 %v5141_v9  ;;  %v3289_v47 = vld [vmem:[%s5162_s5 + $0xe8] sm:$0xf0]  ;;  %v3196_v50 = vor.u32 %v3874_v44, %v3193_v45  ;;  %v3199_v52 = vld [vmem:[%s5162_s5 + $0x30] sm:$0xf]  ;;  %v3877_v53 = vld [vmem:[%s5162_s5 + $0x34] sm:$0xf0] }
  0x31   : > { %v3292_v51 = vor.u32 %v3898_v46, %v3289_v47  ;;  %s6488_s13 = smov (!%p392_p5, %s3157_s13), 0  ;;  %v3295_v54 = vld [vmem:[%s5162_s5 + $0xf0] sm:$0xf]  ;;  %v3901_v55 = vld [vmem:[%s5162_s5 + $0xf4] sm:$0xf0]  ;;  %v3200_v60 = vor.u32 %v3877_v53, %v3199_v52  ;;  %s3172_s18 = sshll.u32 %s417_s30, 2 }
  0x32   : > { %s6490_s13 = smov (!%p3158_p6, %s6488_s13), 7  ;;  %v3876_v56 = vld [vmem:[%s5162_s5 + $0x34] sm:$0xf]  ;;  %v3201_v57 = vld [vmem:[%s5162_s5 + $0x38] sm:$0xf0]  ;;  %v3296_v61 = vor.u32 %v3901_v55, %v3295_v54  ;;  %s376_s17 = sand.u32 1, %s4910_s22  }
  0x33   : > { %755 = vmatpush.bf16.msra.mxu0 %v5149_v10  ;;  %4707 = vmatpush.bf16.msra.mxu2 %v5149_v10  ;;  %v3900_v58 = vld [vmem:[%s5162_s5 + $0xf4] sm:$0xf]  ;;  %v3297_v59 = vld [vmem:[%s5162_s5 + $0xf8] sm:$0xf0]  ;;  %v3204_v62 = vor.u32 %v3876_v56, %v3201_v57  ;;  %s3163_s15 = sshll.u32 %s6490_s13, 4  ;;  %s3151_s30 = sshll.u32 %s376_s17, 10 }
  0x34   : > { %844 = vmatpush.bf16.msra.mxu1 %v5156_v11  ;;  %4715 = vmatpush.bf16.msra.mxu3 %v5156_v11  ;;  %v3300_v63 = vor.u32 %v3900_v58, %v3297_v59  ;;  %s400_s10 = sadd.s32 %s3163_s15, %s5127_s29  ;;  %v3880_v14 = vld [vmem:[%s5162_s5 + $0x54] sm:$0xf]  ;;  %v3217_v17 = vld [vmem:[%s5162_s5 + $0x58] sm:$0xf0]  ;;  %v3225_v29 = vld [vmem:[%s5162_s5 + $0x68] sm:$0xf0] }
  0x35   : > { %s3165_s9 = sshll.u32 %s400_s10, 2  ;;  %v3220_v22 = vor.u32 %v3880_v14, %v3217_v17  ;;  %v3233_v41 = vld [vmem:[%s5162_s5 + $0x78] sm:$0xf0]  ;;  %s5317_s10 = scalar_lea.vmem %s6371_s2, %s3172_s18  ;;  %v3241_v54 = vld [vmem:[%s5162_s5 + $0x88] sm:$0xf0] }
  0x36   : > { %s5273_s19 = scalar_lea.vmem %s6370_s1, %s3165_s9  ;;  %v3399_v52 = vld [vmem:[%s5317_s10] sm:$0xf]  ;;  %v3911_v53 = vld [vmem:[%s5317_s10 + $0x4] sm:$0xf0]  ;;  %v3910_v55 = vld [vmem:[%s5317_s10 + $0x4] sm:$0xf] }
  0x37   : > { %756 = vmatpush.bf16.msra.mxu0 %v5173_v12  ;;  %4708 = vmatpush.bf16.msra.mxu2 %v5173_v12  ;;  %v3375_v16 = vld [vmem:[%s5273_s19 + $0x10] sm:$0xf]  ;;  %v3904_v18 = vld [vmem:[%s5273_s19 + $0x14] sm:$0xf]  ;;  %v3377_v19 = vld [vmem:[%s5273_s19 + $0x18] sm:$0xf0]  ;;  %v3400_v58 = vor.u32 %v3911_v53, %v3399_v52 }
  0x38   : > { %845 = vmatpush.bf16.msra.mxu1 %v5180_v13  ;;  %4716 = vmatpush.bf16.msra.mxu3 %v5180_v13  ;;  %v3380_v23 = vor.u32 %v3904_v18, %v3377_v19  ;;  %v3907_v28 = vld [vmem:[%s5273_s19 + $0x24] sm:$0xf0]  ;;  %v3906_v30 = vld [vmem:[%s5273_s19 + $0x24] sm:$0xf]  ;;  %v3385_v31 = vld [vmem:[%s5273_s19 + $0x28] sm:$0xf0] }
  0x39   : > { %v3388_v35 = vor.u32 %v3906_v30, %v3385_v31  ;;  %v3909_v40 = vld [vmem:[%s5273_s19 + $0x34] sm:$0xf0]  ;;  %v3908_v42 = vld [vmem:[%s5273_s19 + $0x34] sm:$0xf]  ;;  %v3393_v43 = vld [vmem:[%s5273_s19 + $0x38] sm:$0xf0] }
  0x3a   : > { %v3396_v47 = vor.u32 %v3908_v42, %v3393_v43  ;;  %v3401_v56 = vld [vmem:[%s5317_s10 + $0x8] sm:$0xf0]  ;;  %v3409_v14 = vld [vmem:[%s5317_s10 + $0x18] sm:$0xf0]  ;;  %v3255_v31 = vld [vmem:[%s5162_s5 + $0xa0] sm:$0xf] }
  0x3b   : > { %757 = vmatpush.bf16.msra.mxu0 %v5188_v15  ;;  %4709 = vmatpush.bf16.msra.mxu2 %v5188_v15  ;;  %s5991_s16 = scalar_lea.vmem [#allocation5], %s3151_s30  ;;  %s3848_s18 = sshll.u32 %s4922_s25, 9 }
  0x3c   : > { %846 = vmatpush.bf16.msra.mxu1 %v5204_v21  ;;  %4717 = vmatpush.bf16.msra.mxu3 %v5204_v21  ;;  %s2981_s30 = scalar_lea.sflag [#allocation4], %s376_s17 }
  0x3e   : > { %758 = vmatmul.bf16.vlgmr.msra.gmra.mxu0 %v3176_v24  ;;  %818 = vmatmul.bf16.vlgmr.msra.gmra.mxu2 %v3272_v25  ;;  %v3223_v24 = vld [vmem:[%s5162_s5 + $0x60] sm:$0xf]  ;;  %v3883_v25 = vld [vmem:[%s5162_s5 + $0x64] sm:$0xf0] }
  0x3f   : > { %1008 = vmatpush.bf16.msrb.mxu2 %v5071_v0  ;;  %847 = vmatmul.bf16.vlgmr.msra.gmra.mxu1 %v3180_v26  ;;  %v3882_v26 = vld [vmem:[%s5162_s5 + $0x64] sm:$0xf]  ;;  %v3224_v32 = vor.u32 %v3883_v25, %v3223_v24 }
  0x40   : > { %1037 = vmatpush.bf16.msrb.mxu3 %v5076_v1  ;;  %v3228_v34 = vor.u32 %v3882_v26, %v3225_v29 }
  0x41   : > { %907 = vmatmul.bf16.vlgmr.msra.gmra.mxu3 %v3276_v27  ;;  %v3383_v27 = vld [vmem:[%s5273_s19 + $0x20] sm:$0xf] }
  0x42   : > { %v3384_v33 = vor.u32 %v3907_v28, %v3383_v27 }
  0x43   : > { %1009 = vmatpush.bf16.msrb.mxu2 %v5086_v2 }
  0x44   : > { %1038 = vmatpush.bf16.msrb.mxu3 %v5093_v3 }
  0x47   : > { %1010 = vmatpush.bf16.msrb.mxu2 %v5102_v4 }
  0x48   : > { %1039 = vmatpush.bf16.msrb.mxu3 %v5109_v5 }
  0x4b   : > { %1011 = vmatpush.bf16.msrb.mxu2 %v5118_v6 }
  0x4c   : > { %1040 = vmatpush.bf16.msrb.mxu3 %v5125_v7 }
  0x4e   : > { %763 = vmatmul.bf16.gmra.mxu0 %v3184_v36  ;;  %823 = vmatmul.bf16.gmra.mxu2 %v3280_v37  ;;  %v3231_v36 = vld [vmem:[%s5162_s5 + $0x70] sm:$0xf]  ;;  %v3885_v37 = vld [vmem:[%s5162_s5 + $0x74] sm:$0xf0] }
  0x4f   : > { %1012 = vmatpush.bf16.msrb.mxu2 %v5134_v8  ;;  %852 = vmatmul.bf16.gmra.mxu1 %v3188_v38  ;;  %v3884_v38 = vld [vmem:[%s5162_s5 + $0x74] sm:$0xf]  ;;  %v3232_v44 = vor.u32 %v3885_v37, %v3231_v36  ;;  %v3257_v36 = vld [vmem:[%s5162_s5 + $0xa8] sm:$0xf0]  ;;  %v3914_v37 = vld [vmem:[%s5317_s10 + $0x24] sm:$0xf] }
  0x50   : > { %1041 = vmatpush.bf16.msrb.mxu3 %v5141_v9  ;;  %v3236_v46 = vor.u32 %v3884_v38, %v3233_v41  ;;  %v3417_v38 = vld [vmem:[%s5317_s10 + $0x28] sm:$0xf0] }
  0x51   : > { %912 = vmatmul.bf16.gmra.mxu3 %v3284_v39  ;;  %v3391_v39 = vld [vmem:[%s5273_s19 + $0x30] sm:$0xf] }
  0x52   : > { %v3392_v45 = vor.u32 %v3909_v40, %v3391_v39 }
  0x53   : > { %1013 = vmatpush.bf16.msrb.mxu2 %v5149_v10 }
  0x54   : > { %1042 = vmatpush.bf16.msrb.mxu3 %v5156_v11 }
  0x57   : > { %1014 = vmatpush.bf16.msrb.mxu2 %v5173_v12 }
  0x58   : > { %1043 = vmatpush.bf16.msrb.mxu3 %v5180_v13 }
  0x5b   : > { %1015 = vmatpush.bf16.msrb.mxu2 %v5188_v15 }
  0x5c   : > { %1044 = vmatpush.bf16.msrb.mxu3 %v5204_v21 }
  0x5e   : > { %768 = vmatmul.bf16.gmra.mxu0 %v3192_v48  ;;  %828 = vmatmul.bf16.gmra.mxu2 %v3288_v49  ;;  %v5322_v48 = vld [vmem:[%s6373_s4] ss:$0 sm:$0xff] }
  0x5f   : > { %1122 = vmatpush.bf16.msra.mxu2 %v5071_v0  ;;  %857 = vmatmul.bf16.gmra.mxu1 %v3196_v50  ;;  %v3207_v0 = vld [vmem:[%s5162_s5 + $0x40] sm:$0xf]  ;;  %v3887_v50 = vld [vmem:[%s5162_s5 + $0x84] sm:$0xf0] }
  0x60   : > { %1151 = vmatpush.bf16.msra.mxu3 %v5076_v1  ;;  %v3879_v1 = vld [vmem:[%s5162_s5 + $0x44] sm:$0xf0]  ;;  %v3239_v49 = vld [vmem:[%s5162_s5 + $0x80] sm:$0xf] }
  0x61   : > { %917 = vmatmul.bf16.gmra.mxu3 %v3292_v51  ;;  %v3886_v51 = vld [vmem:[%s5162_s5 + $0x84] sm:$0xf]  ;;  %v3240_v57 = vor.u32 %v3887_v50, %v3239_v49 }
  0x63   : > { %1123 = vmatpush.bf16.msra.mxu2 %v5086_v2  ;;  %v3878_v2 = vld [vmem:[%s5162_s5 + $0x44] sm:$0xf] }
  0x64   : > { %1152 = vmatpush.bf16.msra.mxu3 %v5093_v3  ;;  %v3367_v3 = vld [vmem:[%s5273_s19] sm:$0xf] }
  0x67   : > { %1124 = vmatpush.bf16.msra.mxu2 %v5102_v4  ;;  %v3903_v4 = vld [vmem:[%s5273_s19 + $0x4] sm:$0xf0] }
  0x68   : > { %1153 = vmatpush.bf16.msra.mxu3 %v5109_v5  ;;  %v3209_v5 = vld [vmem:[%s5162_s5 + $0x48] sm:$0xf0] }
  0x6b   : > { %1125 = vmatpush.bf16.msra.mxu2 %v5118_v6  ;;  %v3902_v6 = vld [vmem:[%s5273_s19 + $0x4] sm:$0xf] }
  0x6c   : > { %1154 = vmatpush.bf16.msra.mxu3 %v5125_v7  ;;  %v3369_v7 = vld [vmem:[%s5273_s19 + $0x8] sm:$0xf0] }
  0x6e   : > { %773 = vmatmul.bf16.gmra.mxu0 %v3200_v60  ;;  %833 = vmatmul.bf16.gmra.mxu2 %v3296_v61  ;;  %v3244_v60 = vor.u32 %v3886_v51, %v3241_v54  ;;  %v3404_v61 = vor.u32 %v3910_v55, %v3401_v56  ;;  %v3263_v56 = vld [vmem:[%s5162_s5 + $0xb0] sm:$0xf] }
  0x6f   : > { %1126 = vmatpush.bf16.msra.mxu2 %v5134_v8  ;;  %862 = vmatmul.bf16.gmra.mxu1 %v3204_v62  ;;  %v3208_v8 = vor.u32 %v3879_v1, %v3207_v0 }
  0x70   : > { %1155 = vmatpush.bf16.msra.mxu3 %v5141_v9  ;;  %v3368_v9 = vor.u32 %v3903_v4, %v3367_v3 }
  0x71   : > { %922 = vmatmul.bf16.gmra.mxu3 %v3300_v63 }
  0x73   : > { %1127 = vmatpush.bf16.msra.mxu2 %v5149_v10  ;;  %v3212_v10 = vor.u32 %v3878_v2, %v3209_v5 }
  0x74   : > { %1156 = vmatpush.bf16.msra.mxu3 %v5156_v11  ;;  %v3372_v11 = vor.u32 %v3902_v6, %v3369_v7  ;;  %v3247_v7 = vld [vmem:[%s5162_s5 + $0x90] sm:$0xf] }
  0x77   : > { %1128 = vmatpush.bf16.msra.mxu2 %v5173_v12  ;;  %v3215_v12 = vld [vmem:[%s5162_s5 + $0x50] sm:$0xf] }
  0x78   : > { %1157 = vmatpush.bf16.msra.mxu3 %v5180_v13  ;;  %v3881_v13 = vld [vmem:[%s5162_s5 + $0x54] sm:$0xf0] }
  0x79   : > { %v3216_v20 = vor.u32 %v3881_v13, %v3215_v12  ;;  %v3249_v12 = vld [vmem:[%s5162_s5 + $0x98] sm:$0xf0]  ;;  %v3912_v13 = vld [vmem:[%s5317_s10 + $0x14] sm:$0xf] }
  0x7b   : > { %1129 = vmatpush.bf16.msra.mxu2 %v5188_v15  ;;  %v3905_v15 = vld [vmem:[%s5273_s19 + $0x14] sm:$0xf0]  ;;  %s3934_s19 = sshll.u32 %s4918_s24, 8 }
  0x7c   : > { %1158 = vmatpush.bf16.msra.mxu3 %v5204_v21  ;;  %v3376_v21 = vor.u32 %v3905_v15, %v3375_v16  ;;  %s2993_s13 = sadd.s32 %s3934_s19, %s3848_s18 }
  0x7d   : > { %s3849_s15 = sshll.u32 %s2993_s13, 2  ;;  %s4856_s13 = scalar_lea.hbm %s6375_s6, 4096 }
  0x7e   : > { %778 = vmatmul.bf16.gmra.mxu0 %v3208_v8  ;;  %1016 = vmatmul.bf16.vlgmr.msrb.gmra.mxu2 %v3368_v9  ;;  %v3889_v8 = vld [vmem:[%s5162_s5 + $0x94] sm:$0xf0]  ;;  %v3888_v9 = vld [vmem:[%s5162_s5 + $0x94] sm:$0xf]  ;;  %s2995_s14 = scalar_lea.hbm %s6375_s6, %s3849_s15 }
  0x7f   : > { %867 = vmatmul.bf16.gmra.mxu1 %v3212_v10  ;;  %v3407_v10 = vld [vmem:[%s5317_s10 + $0x10] sm:$0xf]  ;;  %v3248_v17 = vor.u32 %v3889_v8, %v3247_v7  ;;  %s2998_s29 = sshll.u32 %s2995_s14, 4  ;;  %s2999_s29 = int_to_ptr.hbm [resolvable:$true] %s2998_s29 }
  0x80   : > { %s4850_s24 = sshra.s32 %s2999_s29, 4  ;;  %s4851_s24 = int_to_ptr.hbm [resolvable:$true] %s4850_s24 }
  0x81   : > { %1045 = vmatmul.bf16.vlgmr.msrb.gmra.mxu3 %v3372_v11  ;;  %v3913_v11 = vld [vmem:[%s5317_s10 + $0x14] sm:$0xf0]  ;;  %s4852_s25 = scalar_lea.hbm %s4851_s24, 1024  ;;  %p4857_p11 = scmp.lt.s32.totalorder %s4851_s24, %s6375_s6 }
  0x82   : > { %v3408_v18 = vor.u32 %v3913_v11, %v3407_v10  ;;  %p4853_p7 = scmp.ne.s32.totalorder %s4851_s24, %s4852_s25  ;;  %p4858_p12 = scmp.lt.s32.totalorder %s4856_s13, %s4852_s25 }
  0x84   : > { %p4854_p9 = pnand %p4853_p7, %p5028_p3  ;;  %p4859_p13 = por %p4858_p12, %p4857_p11 }
  0x86   : > { %p4855_p10 = pneg %p4854_p9 }
  0x88   : > { %p4860_p0 = pnand %p4859_p13, %p4855_p10 }
  0x8e   : > { %783 = vmatmul.bf16.gmra.mxu0 %v3216_v20  ;;  %1021 = vmatmul.bf16.gmra.mxu2 %v3376_v21  ;;  %v3252_v20 = vor.u32 %v3888_v9, %v3249_v12  ;;  %v3412_v21 = vor.u32 %v3912_v13, %v3409_v14 }
  0x8f   : > { %872 = vmatmul.bf16.gmra.mxu1 %v3220_v22 }
  0x91   : > { %1050 = vmatmul.bf16.gmra.mxu3 %v3380_v23 }
  0x9e   : > { %788 = vmatmul.bf16.gmra.mxu0 %v3224_v32  ;;  %1026 = vmatmul.bf16.gmra.mxu2 %v3384_v33  ;;  %v3891_v32 = vld [vmem:[%s5162_s5 + $0xa4] sm:$0xf0]  ;;  %v3890_v33 = vld [vmem:[%s5162_s5 + $0xa4] sm:$0xf] }
  0x9f   : > { %877 = vmatmul.bf16.gmra.mxu1 %v3228_v34  ;;  %v3415_v34 = vld [vmem:[%s5317_s10 + $0x20] sm:$0xf]  ;;  %v3256_v41 = vor.u32 %v3891_v32, %v3255_v31 }
  0xa1   : > { %1055 = vmatmul.bf16.gmra.mxu3 %v3388_v35  ;;  %v3915_v35 = vld [vmem:[%s5317_s10 + $0x24] sm:$0xf0] }
  0xa2   : > { %v3416_v42 = vor.u32 %v3915_v35, %v3415_v34 }
  0xae   : > { %793 = vmatmul.bf16.gmra.mxu0 %v3232_v44  ;;  %1031 = vmatmul.bf16.gmra.mxu2 %v3392_v45  ;;  %v3260_v44 = vor.u32 %v3890_v33, %v3257_v36  ;;  %v3420_v45 = vor.u32 %v3914_v37, %v3417_v38 }
  0xaf   : > { %882 = vmatmul.bf16.gmra.mxu1 %v3236_v46 }
  0xb1   : > { %1060 = vmatmul.bf16.gmra.mxu3 %v3396_v47 }
  0xbb   : > { %v759_v59 = vpop.f32.mrf.mxu0 }
  0xbc   : > { %v760_v62 = vadd.f32 %v5322_v48, %v759_v59  ;;  %v848_v63 = vpop.f32.mrf.mxu1  ;;  %v3423_v59 = vld [vmem:[%s5317_s10 + $0x30] sm:$0xf] }
  0xbe   : > { %v5333_v0 = vadd.f32 %v848_v63, %v760_v62  ;;  %798 = vmatmul.bf16.gmra.mxu0 %v3240_v57  ;;  %1130 = vmatmul.bf16.vlgmr.msra.gmra.mxu2 %v3400_v58  ;;  %v3893_v57 = vld [vmem:[%s5162_s5 + $0xb4] sm:$0xf0]  ;;  %v3892_v58 = vld [vmem:[%s5162_s5 + $0xb4] sm:$0xf]  ;;  %v3425_v63 = vld [vmem:[%s5317_s10 + $0x38] sm:$0xf0] }
  0xbf   : > { %887 = vmatmul.bf16.gmra.mxu1 %v3244_v60  ;;  %v3917_v60 = vld [vmem:[%s5317_s10 + $0x34] sm:$0xf0]  ;;  %v3916_v62 = vld [vmem:[%s5317_s10 + $0x34] sm:$0xf] }
  0xc0   : > { %v3424_v7 = vor.u32 %v3917_v60, %v3423_v59  ;;  %v3428_v10 = vor.u32 %v3916_v62, %v3425_v63  ;;  %v928_v31 = vmax.f32 %v5333_v0, 0.0 }
  0xc1   : > { %1159 = vmatmul.bf16.vlgmr.msra.gmra.mxu3 %v3404_v61  ;;  %v819_v1 = vpop.f32.mrf.mxu2  ;;  %v3265_v61 = vld [vmem:[%s5162_s5 + $0xb8] sm:$0xf0]  ;;  %s2996_s5 = sshll.u32 %s5991_s16, 4  ;;  %s2997_s5 = int_to_ptr.vmem [resolvable:$true] %s2996_s5 }
  0xc2   : > { %v820_v2 = vadd.f32 %v5322_v48, %v819_v1  ;;  %v3268_v9 = vor.u32 %v3892_v58, %v3265_v61  ;;  %v1188_v35 = vmul.f32 0.75, %v928_v31 }
  0xc3   : > { %v5336_v4 = vpop.f32.mrf.mxu0 }
  0xc4   : > { %v908_v3 = vpop.f32.mrf.mxu3  ;;  %v5338_v5 = vpop.f32.mrf.mxu1  ;;  %v762_v60 = vadd.f32 %v5322_v48, %v5336_v4 }
  0xc5   : > { %v5340_v6 = vadd.f32 %v908_v3, %v820_v2  ;;  %v3264_v3 = vor.u32 %v3893_v57, %v3263_v56 }
  0xc9   : > { %v5350_v16 = vpop.f32.mrf.mxu2 }
  0xcb   : > { %v764_v19 = vpop.f32.mrf.mxu0 }
  0xcc   : > { %v5352_v15 = vpop.f32.mrf.mxu3  ;;  %v765_v22 = vadd.f32 %v5322_v48, %v764_v19  ;;  %v853_v23 = vpop.f32.mrf.mxu1 }
  0xce   : > { %v5355_v24 = vadd.f32 %v853_v23, %v765_v22  ;;  %803 = vmatmul.bf16.gmra.mxu0 %v3248_v17  ;;  %1135 = vmatmul.bf16.gmra.mxu2 %v3408_v18 }
  0xcf   : > { %892 = vmatmul.bf16.gmra.mxu1 %v3252_v20 }
  0xd1   : > { %1164 = vmatmul.bf16.gmra.mxu3 %v3412_v21  ;;  %v824_v25 = vpop.f32.mrf.mxu2 }
  0xd2   : > { %v825_v26 = vadd.f32 %v5322_v48, %v824_v25 }
  0xd3   : > { %v5358_v28 = vpop.f32.mrf.mxu0 }
  0xd4   : > { %v913_v27 = vpop.f32.mrf.mxu3  ;;  %v5360_v29 = vpop.f32.mrf.mxu1  ;;  %v767_v61 = vadd.f32 %v5322_v48, %v5358_v28 }
  0xd5   : > { %v5362_v30 = vadd.f32 %v913_v27, %v825_v26 }
  0xd9   : > { %v5372_v39 = vpop.f32.mrf.mxu2 }
  0xdb   : > { %v769_v43 = vpop.f32.mrf.mxu0 }
  0xdc   : > { %v5374_v40 = vpop.f32.mrf.mxu3  ;;  %v770_v46 = vadd.f32 %v5322_v48, %v769_v43  ;;  %v858_v47 = vpop.f32.mrf.mxu1 }
  0xde   : > { %v5377_v49 = vadd.f32 %v858_v47, %v770_v46  ;;  %808 = vmatmul.bf16.gmra.mxu0 %v3256_v41  ;;  %1140 = vmatmul.bf16.gmra.mxu2 %v3416_v42 }
  0xdf   : > { %897 = vmatmul.bf16.gmra.mxu1 %v3260_v44 }
  0xe1   : > { %1169 = vmatmul.bf16.gmra.mxu3 %v3420_v45  ;;  %v829_v50 = vpop.f32.mrf.mxu2 }
  0xe2   : > { %v830_v51 = vadd.f32 %v5322_v48, %v829_v50 }
  0xe3   : > { %v5380_v53 = vpop.f32.mrf.mxu0 }
  0xe4   : > { %v918_v52 = vpop.f32.mrf.mxu3  ;;  %v5382_v54 = vpop.f32.mrf.mxu1 }
  0xe5   : > { %v5384_v55 = vadd.f32 %v918_v52, %v830_v51 }
  0xe9   : > { %v5394_v1 = vpop.f32.mrf.mxu2 }
  0xeb   : > { %v774_v8 = vpop.f32.mrf.mxu0 }
  0xec   : > { %v5396_v2 = vpop.f32.mrf.mxu3  ;;  %v775_v11 = vadd.f32 %v5322_v48, %v774_v8  ;;  %v863_v12 = vpop.f32.mrf.mxu1  ;;  %v772_v8 = vadd.f32 %v5322_v48, %v5380_v53  ;;  %v1252_v53 = vmul.f32 0.25, %v928_v31 }
  0xee   : > { %v5399_v13 = vadd.f32 %v863_v12, %v775_v11  ;;  %813 = vmatmul.bf16.gmra.mxu0 %v3264_v3  ;;  %1145 = vmatmul.bf16.gmra.mxu2 %v3424_v7  ;;  %v851_v7 = vadd.f32 %v5338_v5, %v762_v60  ;;  %v856_v11 = vadd.f32 %v5360_v29, %v767_v61  ;;  %v952_v12 = vmax.f32 %v5340_v6, 0.0 }
  0xef   : > { %902 = vmatmul.bf16.gmra.mxu1 %v3268_v9  ;;  %v930_v5 = vmax.f32 %v5355_v24, 0.0  ;;  %v932_v6 = vmax.f32 %v5377_v49, 0.0 }
  0xf0   : > { %v5445_v29 = vmul.f32 0.75, %v952_v12  ;;  %v934_v49 = vmax.f32 %v5399_v13, 0.0 }
  0xf1   : > { %1174 = vmatmul.bf16.gmra.mxu3 %v3428_v10  ;;  %v834_v14 = vpop.f32.mrf.mxu2  ;;  %v5451_v31 = vmul.f32 0.75, %v930_v5  ;;  %v5460_v60 = vmul.f32 0.75, %v932_v6  ;;  %v5462_v61 = vmul.f32 0.25, %v932_v6 }
  0xf2   : > { %v835_v17 = vadd.f32 %v5322_v48, %v834_v14  ;;  %v929_v14 = vmax.f32 %v851_v7, 0.0 }
  0xf3   : > { %v776_v19 = vpop.f32.mrf.mxu0 }
  0xf4   : > { %v923_v18 = vpop.f32.mrf.mxu3  ;;  %v865_v20 = vpop.f32.mrf.mxu1  ;;  %v777_v28 = vadd.f32 %v5322_v48, %v776_v19 }
  0xf5   : > { %v5402_v21 = vadd.f32 %v923_v18, %v835_v17  ;;  %v861_v17 = vadd.f32 %v5382_v54, %v772_v8  ;;  %v5449_v54 = vmul.f32 0.75, %v929_v14 }
  0xf7   : > { %6403 = vst [vmem:[#allocation8_spill] sm:$0xff] %v5402_v21  ;;  %v933_v24 = vmax.f32 %v861_v17, 0.0  ;;  %v5478_v17 = vmul.f32 0.75, %v934_v49 }
  0xf9   : > { %v5404_v22 = vpop.f32.mrf.mxu2  ;;  %v5474_v13 = vmul.f32 0.25, %v933_v24 }
  0xfb   : > { %v779_v25 = vpop.f32.mrf.mxu0 }
  0xfc   : > { %v5406_v23 = vpop.f32.mrf.mxu3  ;;  %v780_v26 = vadd.f32 %v5322_v48, %v779_v25  ;;  %v868_v27 = vpop.f32.mrf.mxu1  ;;  %v931_v25 = vmax.f32 %v856_v11, 0.0 }
  0xfe   : > { %v5410_v32 = vadd.f32 %v868_v27, %v780_v26  ;;  %v5441_v27 = vmul.f32 0.25, %v952_v12 }
 0x100   : > { %v936_v33 = vmax.f32 %v5410_v32, 0.0 }
 0x101   : > { %v1017_v34 = vpop.f32.mrf.mxu2 }
 0x102   : > { %v5415_v36 = vmul.f32 0.25, %v936_v33  ;;  %v1018_v37 = vadd.f32 %v5322_v48, %v1017_v34  ;;  %v5468_v11 = vmul.f32 0.75, %v936_v33 }
 0x103   : > { %v781_v41 = vpop.f32.mrf.mxu0 }
 0x104   : > { %v1046_v38 = vpop.f32.mrf.mxu3  ;;  %v5419_v42 = vadd.f32 %v5415_v36, %v1188_v35  ;;  %v870_v43 = vpop.f32.mrf.mxu1  ;;  %v782_v9 = vadd.f32 %v5322_v48, %v781_v41  ;;  %v1253_v41 = vmul.f32 0.25, %v929_v14  ;;  %6404 = vst [vmem:[#allocation9_spill] sm:$0xff] %v5468_v11 }
 0x105   : > { %v1047_v44 = vadd.f32 %v1046_v38, %v1018_v37  ;;  %v866_v37 = vadd.f32 %v865_v20, %v777_v28 }
 0x106   : > { %v871_v18 = vadd.f32 %v870_v43, %v782_v9  ;;  %v5464_v9 = vmul.f32 0.75, %v933_v24 }
 0x107   : > { %v1066_v0 = vmax.f32 %v1047_v44, 0.0  ;;  %v935_v7 = vmax.f32 %v866_v37, 0.0 }
 0x108   : > { %v937_v43 = vmax.f32 %v871_v18, 0.0 }
 0x109   : > { %v1196_v45 = vmul.f32 0.25, %v1066_v0  ;;  %v1019_v46 = vpop.f32.mrf.mxu2  ;;  %v1254_v0 = vmul.f32 0.25, %v930_v5  ;;  %v5483_v5 = vmul.f32 0.25, %v934_v49 }
 0x10a   : > { %v5472_v12 = vmul.f32 0.75, %v937_v43 }
 0x10b   : > { %v5421_v47 = vadd.f32 %v1196_v45, %v1188_v35  ;;  %v784_v51 = vpop.f32.mrf.mxu0  ;;  %v5453_v45 = vmul.f32 0.75, %v931_v25 }
 0x10c   : > { %v1048_v50 = vpop.f32.mrf.mxu3  ;;  %v873_v52 = vpop.f32.mrf.mxu1  ;;  %v785_v4 = vadd.f32 %v5322_v48, %v784_v51  ;;  %v1020_v51 = vadd.f32 %v5322_v48, %v1019_v46  ;;  %v5470_v46 = vmul.f32 0.25, %v937_v43  ;;  %6406 = vst [vmem:[#allocation11_spill] sm:$0xff] %v5472_v12 }
 0x10e   : > { %v874_v34 = vadd.f32 %v873_v52, %v785_v4  ;;  %v5456_v52 = vmul.f32 0.25, %v931_v25  ;;  %6405 = vst [vmem:[#allocation10_spill] sm:$0xff] %v5470_v46  ;;  %v1049_v4 = vadd.f32 %v1048_v50, %v1020_v51  ;;  %v5485_v25 = vmul.f32 0.75, %v935_v7 }
 0x110   : > { %v938_v20 = vmax.f32 %v874_v34, 0.0  ;;  %v5487_v34 = vmul.f32 0.25, %v935_v7  ;;  %v1067_v24 = vmax.f32 %v1049_v4, 0.0 }
 0x111   : > { %v1022_v56 = vpop.f32.mrf.mxu2 }
 0x112   : > { %v1023_v32 = vadd.f32 %v5322_v48, %v1022_v56  ;;  %v5498_v56 = vadd.f32 %v1253_v41, %v5472_v12 }
 0x113   : > { %v786_v58 = vpop.f32.mrf.mxu0 }
 0x114   : > { %v5423_v57 = vpop.f32.mrf.mxu3  ;;  %v875_v59 = vpop.f32.mrf.mxu1  ;;  %v787_v19 = vadd.f32 %v5322_v48, %v786_v58 }
 0x116   : > { %v876_v8 = vadd.f32 %v875_v59, %v787_v19  ;;  %v5480_v59 = vmul.f32 0.25, %v938_v20 }
 0x118   : > { %6407 = vst [vmem:[#allocation12_spill] sm:$0xff] %v5480_v59  ;;  %v939_v50 = vmax.f32 %v876_v8, 0.0  ;;  %v5505_v49 = vadd.f32 %v5480_v59, %v5451_v31 }
 0x119   : > { %v1024_v62 = vpop.f32.mrf.mxu2 }
 0x11a   : > { %v5514_v4 = vmul.f32 0.75, %v939_v50 }
 0x11b   : > { %v789_v3 = vpop.f32.mrf.mxu0 }
 0x11c   : > { %v5429_v63 = vpop.f32.mrf.mxu3  ;;  %v878_v10 = vpop.f32.mrf.mxu1  ;;  %v790_v58 = vadd.f32 %v5322_v48, %v789_v3  ;;  %v1025_v3 = vadd.f32 %v5322_v48, %v1024_v62  ;;  %v5491_v62 = vadd.f32 %v5470_v46, %v5449_v54  ;;  %6410 = vst [vmem:[#allocation15_spill] sm:$0xff] %v5514_v4 }
 0x11e   : > { %v879_v33 = vadd.f32 %v878_v10, %v790_v58  ;;  %v5500_v10 = vmul.f32 0.75, %v938_v20  ;;  %v1054_v43 = vadd.f32 %v5429_v63, %v1025_v3  ;;  %v1052_v58 = vadd.f32 %v5423_v57, %v1023_v32 }
 0x11f   : > { %v5520_v3 = vmul.f32 0.25, %v1067_v24 }
 0x120   : > { %6408 = vst [vmem:[#allocation13_spill] sm:$0xff] %v5500_v10  ;;  %v940_v7 = vmax.f32 %v879_v33, 0.0 }
 0x121   : > { %v1027_v26 = vpop.f32.mrf.mxu2 }
 0x122   : > { %v1028_v41 = vadd.f32 %v5322_v48, %v1027_v26  ;;  %v5534_v24 = vmul.f32 0.75, %v940_v7 }
 0x123   : > { %v791_v38 = vpop.f32.mrf.mxu0 }
 0x124   : > { %v5443_v35 = vpop.f32.mrf.mxu3  ;;  %v880_v44 = vpop.f32.mrf.mxu1  ;;  %v792_v28 = vadd.f32 %v5322_v48, %v791_v38  ;;  %v5495_v38 = vadd.f32 %v1252_v53, %v5468_v11  ;;  %6412 = vst [vmem:[#allocation17_spill] sm:$0xff] %v5534_v24 }
 0x126   : > { %v881_v51 = vadd.f32 %v880_v44, %v792_v28  ;;  %v1069_v28 = vmax.f32 %v1054_v43, 0.0  ;;  %v1057_v43 = vadd.f32 %v5443_v35, %v1028_v41 }
 0x128   : > { %v941_v32 = vmax.f32 %v881_v51, 0.0 }
 0x129   : > { %v1029_v14 = vpop.f32.mrf.mxu2 }
 0x12a   : > { %v1030_v20 = vadd.f32 %v5322_v48, %v1029_v14  ;;  %v1068_v14 = vmax.f32 %v1052_v58, 0.0  ;;  %v5544_v59 = vmul.f32 0.25, %v941_v32 }
 0x12b   : > { %v794_v6 = vpop.f32.mrf.mxu0 }
 0x12c   : > { %v1058_v18 = vpop.f32.mrf.mxu3  ;;  %v795_v37 = vadd.f32 %v5322_v48, %v794_v6  ;;  %v883_v19 = vpop.f32.mrf.mxu1  ;;  %v5510_v6 = vmul.f32 0.25, %v939_v50  ;;  %v5527_v50 = vmul.f32 0.25, %v940_v7  ;;  %6414 = vst [vmem:[#allocation19_spill] sm:$0xff] %v5544_v59 }
 0x12d   : > { %v1059_v51 = vadd.f32 %v1058_v18, %v1030_v20  ;;  %v5550_v18 = vmul.f32 0.25, %v1068_v14 }
 0x12e   : > { %v884_v8 = vadd.f32 %v883_v19, %v795_v37  ;;  %6409 = vst [vmem:[#allocation14_spill] sm:$0xff] %v5510_v6  ;;  %v5523_v37 = vadd.f32 %v1254_v0, %v5500_v10  ;;  %v5532_v53 = vadd.f32 %v5510_v6, %v5453_v45  ;;  %v1199_v10 = vmul.f32 0.25, %v1069_v28 }
 0x12f   : > { %6411 = vst [vmem:[#allocation16_spill] sm:$0xff] %v5527_v50  ;;  %v1232_v7 = vadd.f32 %v5527_v50, %v5460_v60  ;;  %v5558_v28 = vadd.f32 %v5462_v61, %v5534_v24 }
 0x130   : > { %v942_v63 = vmax.f32 %v884_v8, 0.0 }
 0x131   : > { %v1032_v33 = vpop.f32.mrf.mxu2 }
 0x132   : > { %v1033_v19 = vadd.f32 %v5322_v48, %v1032_v33  ;;  %v5537_v57 = vmul.f32 0.25, %v942_v63  ;;  %v5542_v33 = vadd.f32 %v5456_v52, %v5514_v4  ;;  %v5546_v6 = vmul.f32 0.75, %v942_v63 }
 0x133   : > { %v796_v0 = vpop.f32.mrf.mxu0  ;;  %v1071_v52 = vmax.f32 %v1059_v51, 0.0  ;;  %v1240_v51 = vpack.c.bf16 %v1232_v7, %v1232_v7 }
 0x134   : > { %v1061_v8 = vpop.f32.mrf.mxu3  ;;  %6413 = vst [vmem:[#allocation18_spill] sm:$0xff] %v5537_v57  ;;  %v797_v44 = vadd.f32 %v5322_v48, %v796_v0  ;;  %v885_v58 = vpop.f32.mrf.mxu1  ;;  %v1234_v63 = vadd.f32 %v5537_v57, %v5478_v17  ;;  %v1266_v61 = vadd.f32 %v5483_v5, %v5546_v6 }
 0x135   : > { %v1062_v26 = vadd.f32 %v1061_v8, %v1033_v19  ;;  %6415 = vst [vmem:[#allocation20_spill] sm:$0xff] %v5546_v6  ;;  %v5554_v19 = vmul.f32 0.75, %v941_v32  ;;  %v1070_v8 = vmax.f32 %v1057_v43, 0.0  ;;  %v1233_v32 = vadd.f32 %v5544_v59, %v5464_v9 }
 0x136   : > { %v886_v41 = vadd.f32 %v885_v58, %v797_v44  ;;  %v5567_v44 = vadd.f32 %v1199_v10, %v5453_v45  ;;  %v1201_v24 = vmul.f32 0.25, %v1071_v52  ;;  %v1242_v59 = vpack.c.bf16 %v1234_v63, %v1234_v63 }
 0x137   : > { %v1072_v20 = vmax.f32 %v1062_v26, 0.0  ;;  %6416 = vst [vmem:[#allocation21_spill] sm:$0xff] %v5554_v19  ;;  %v1200_v35 = vmul.f32 0.25, %v1070_v8  ;;  %v1265_v10 = vadd.f32 %v5474_v13, %v5554_v19  ;;  %v1274_v52 = vpack.c.bf16 %v1266_v61, %v1266_v61 }
 0x138   : > { %v943_v0 = vmax.f32 %v886_v41, 0.0  ;;  %v1241_v4 = vpack.c.bf16 %v1233_v32, %v1233_v32  ;;  %v1432_v12 = vunpack.c.l.b16 %v1240_v51  ;;  %v1209_v63 = vadd.f32 %v1201_v24, %v5464_v9 }
 0x139   : > { %v1202_v26 = vmul.f32 0.25, %v1072_v20  ;;  %v1034_v43 = vpop.f32.mrf.mxu2  ;;  %v1272_v20 = vpack.c.bf16 %v5558_v28, %v5558_v28  ;;  %v1208_v28 = vadd.f32 %v1200_v35, %v5460_v60  ;;  %v1273_v46 = vpack.c.bf16 %v1265_v10, %v1265_v10 }
 0x13a   : > { %v5573_v58 = vmul.f32 0.25, %v943_v0  ;;  %v5575_v41 = vmul.f32 0.75, %v943_v0  ;;  %v1035_v14 = vadd.f32 %v5322_v48, %v1034_v43  ;;  %v1433_v61 = vunpack.c.l.b16 %v1241_v4 }
 0x13b   : > { %v799_v45 = vpop.f32.mrf.mxu0  ;;  %v1210_v43 = vadd.f32 %v1202_v26, %v5478_v17  ;;  %v1458_v26 = vunpack.c.l.b16 %v1274_v52  ;;  %v1217_v35 = vpack.c.bf16 %v1209_v63, %v1209_v63  ;;  %v1456_v10 = vunpack.c.l.b16 %v1272_v20 }
 0x13c   : > { %6417 = vst [vmem:[#allocation22_spill] sm:$0xff] %v5573_v58  ;;  %v1063_v57 = vpop.f32.mrf.mxu3  ;;  %v1235_v5 = vadd.f32 %v5573_v58, %v5485_v25  ;;  %v800_v7 = vadd.f32 %v5322_v48, %v799_v45  ;;  %v888_v0 = vpop.f32.mrf.mxu1  ;;  %v1267_v8 = vadd.f32 %v5487_v34, %v5575_v41  ;;  %v1434_v45 = vunpack.c.l.b16 %v1242_v59 }
 0x13d   : > { %v1064_v6 = vadd.f32 %v1063_v57, %v1035_v14  ;;  %v1218_v17 = vpack.c.bf16 %v1210_v43, %v1210_v43  ;;  %v1205_v52 = vadd.f32 %v5520_v3, %v5449_v54  ;;  %v1409_v20 = vunpack.c.l.b16 %v1217_v35 }
 0x13e   : > { %v1243_v50 = vpack.c.bf16 %v1235_v5, %v1235_v5  ;;  %v889_v13 = vadd.f32 %v888_v0, %v800_v7  ;;  %v1275_v58 = vpack.c.bf16 %v1267_v8, %v1267_v8  ;;  %v1438_v8 = vpack.c.b16 %v1433_v61, %v1432_v12 }
 0x13f   : > { %v1073_v19 = vmax.f32 %v1064_v6, 0.0  ;;  %v1410_v0 = vunpack.c.l.b16 %v1218_v17  ;;  %v6421_v54 = vpack.c.bf16 %v5523_v37, %v5523_v37 }
 0x140   : > { %v1435_v11 = vunpack.c.l.b16 %v1243_v50  ;;  %v944_v57 = vmax.f32 %v889_v13, 0.0  ;;  %v1459_v21 = vunpack.c.l.b16 %v1275_v58  ;;  %v1457_v50 = vunpack.c.l.b16 %v1273_v46 }
 0x141   : > { %v1203_v14 = vmul.f32 0.25, %v1073_v19  ;;  %v1131_v34 = vpop.f32.mrf.mxu2  ;;  %v1454_v3 = vunpack.c.l.b16 %v6421_v54 }
 0x142   : > { %v5590_v32 = vmul.f32 0.25, %v944_v57  ;;  %v1300_v5 = vmul.f32 0.75, %v944_v57  ;;  %v1439_v51 = vpack.c.b16 %v1435_v11, %v1434_v45  ;;  %v1463_v24 = vpack.c.b16 %v1459_v21, %v1458_v26 }
 0x143   : > { %v1211_v6 = vadd.f32 %v1203_v14, %v5485_v25  ;;  %v5593_v9 = vpop.f32.mrf.mxu0  ;;  %v1132_v59 = vadd.f32 %v5322_v48, %v1131_v34  ;;  %v1206_v21 = vadd.f32 %v5550_v18, %v5451_v31  ;;  %v1462_v13 = vpack.c.b16 %v1457_v50, %v1456_v10 }
 0x144   : > { %v1160_v60 = vpop.f32.mrf.mxu3  ;;  %v5597_v19 = vadd.f32 %v1300_v5, %v5415_v36  ;;  %v5600_v58 = vadd.f32 %v5441_v27, %v1300_v5  ;;  %v5604_v4 = vadd.f32 %v5445_v29, %v5590_v32  ;;  %v5606_v11 = vpop.f32.mrf.mxu1  ;;  %1842 = vmatpush.bf16.msrb.mxu3 %v1439_v51  ;;  %1931 = vmatpush.bf16.msrb.mxu0 %v1463_v24 }
 0x145   : > { %v1219_v25 = vpack.c.bf16 %v1211_v6, %v1211_v6  ;;  %v1161_v46 = vadd.f32 %v1160_v60, %v1132_v59  ;;  %v6418_v36 = vpack.c.bf16 %v5532_v53, %v5532_v53  ;;  %v1216_v27 = vpack.c.bf16 %v1208_v28, %v1208_v28 }
 0x146   : > { %v6419_v45 = vpack.c.bf16 %v5542_v33, %v5542_v33  ;;  %v1215_v18 = vpack.c.bf16 %v5567_v44, %v5567_v44  ;;  %v6420_v28 = vpack.c.bf16 %v5505_v49, %v5505_v49  ;;  %v1268_v33 = vpack.c.bf16 %v5495_v38, %v5495_v38 }
 0x147   : > { %v1431_v7 = vunpack.c.l.b16 %v6418_v36  ;;  %v1411_v43 = vunpack.c.l.b16 %v1219_v25  ;;  %v1180_v63 = vmax.f32 %v1161_v46, 0.0  ;;  %v1214_v17 = vpack.c.bf16 %v1206_v21, %v1206_v21 }
 0x148   : > { %v1455_v31 = vunpack.c.l.b16 %v6419_v45  ;;  %1843 = vmatpush.bf16.msrb.mxu3 %v1438_v8  ;;  %v1430_v57 = vunpack.c.l.b16 %v6420_v28  ;;  %1932 = vmatpush.bf16.msrb.mxu0 %v1462_v13  ;;  %v1408_v44 = vunpack.c.l.b16 %v1216_v27  ;;  %v6422_v34 = vpack.c.bf16 %v5491_v62, %v5491_v62 }
 0x149   : > { %v1415_v53 = vpack.c.b16 %v1411_v43, %v1410_v0  ;;  %v1372_v12 = vmul.f32 0.25, %v1180_v63  ;;  %v5626_v14 = vpop.f32.mrf.mxu2  ;;  %v6424_v51 = vpack.c.bf16 %v5498_v56, %v5498_v56  ;;  %v1213_v38 = vpack.c.bf16 %v1205_v52, %v1205_v52 }
 0x14a   : > { %v1437_v26 = vpack.c.b16 %v1431_v7, %v1430_v57  ;;  %v1429_v49 = vunpack.c.l.b16 %v6422_v34  ;;  %v1461_v6 = vpack.c.b16 %v1455_v31, %v1454_v3  ;;  %v1407_v35 = vunpack.c.l.b16 %v1215_v18 }
 0x14b   : > { %1753 = vmatpush.bf16.msrb.mxu2 %v1415_v53  ;;  %v5636_v5 = vadd.f32 %v1372_v12, %v5445_v29  ;;  %v804_v37 = vpop.f32.mrf.mxu0  ;;  %v1453_v60 = vunpack.c.l.b16 %v6424_v51  ;;  %v1414_v59 = vpack.c.b16 %v1409_v20, %v1408_v44  ;;  %v6425_v62 = vpack.c.bf16 %v5419_v42, %v5419_v42 }
 0x14c   : > { %v5633_v61 = vpop.f32.mrf.mxu3  ;;  %v893_v24 = vpop.f32.mrf.mxu1  ;;  %1844 = vmatpush.bf16.msrb.mxu3 %v1437_v26  ;;  %1933 = vmatpush.bf16.msrb.mxu0 %v1461_v6  ;;  %v1452_v25 = vunpack.c.l.b16 %v1268_v33  ;;  %v1212_v29 = vpack.c.bf16 %v5421_v47, %v5421_v47  ;;  %v1406_v21 = vunpack.c.l.b16 %v1214_v17  ;;  %v1405_v56 = vunpack.c.l.b16 %v1213_v38  ;;  %v6426_v17 = vld [vmem:[#allocation8_spill] sm:$0xff] }
 0x14d   : > { %6423 = vst [vmem:[#allocation23_spill] sm:$0xff] %v5636_v5  ;;  %v1428_v50 = vunpack.c.l.b16 %v6425_v62  ;;  %v822_v42 = vadd.f32 %v5322_v48, %v5350_v16  ;;  %v827_v52 = vadd.f32 %v5322_v48, %v5372_v39  ;;  %v802_v13 = vadd.f32 %v5322_v48, %v5593_v9 }
 0x14e   : > { %v1460_v46 = vpack.c.b16 %v1453_v60, %v1452_v25  ;;  %v1413_v36 = vpack.c.b16 %v1407_v35, %v1406_v21  ;;  %v1404_v27 = vunpack.c.l.b16 %v1212_v29  ;;  %v832_v45 = vadd.f32 %v5322_v48, %v5394_v1 }
 0x14f   : > { %1754 = vmatpush.bf16.msrb.mxu2 %v1414_v59  ;;  %v1436_v10 = vpack.c.b16 %v1429_v49, %v1428_v50  ;;  %v911_v63 = vadd.f32 %v5352_v15, %v822_v42  ;;  %v837_v31 = vadd.f32 %v5322_v48, %v5404_v22  ;;  %v916_v16 = vadd.f32 %v5374_v40, %v827_v52 }
 0x150   : > { %1934 = vmatpush.bf16.msrb.mxu0 %v1460_v46  ;;  %v1412_v47 = vpack.c.b16 %v1405_v56, %v1404_v27  ;;  %v891_v18 = vadd.f32 %v5606_v11, %v802_v13  ;;  %v805_v20 = vadd.f32 %v5322_v48, %v804_v37  ;;  %v921_v28 = vadd.f32 %v5396_v2, %v832_v45  ;;  %v6429_v27 = vld [vmem:[#allocation9_spill] sm:$0xff] }
 0x151   : > { %1845 = vmatpush.bf16.msrb.mxu3 %v1436_v10  ;;  %v5646_v7 = vpop.f32.mrf.mxu2  ;;  %v953_v9 = vmax.f32 %v911_v63, 0.0  ;;  %v954_v57 = vmax.f32 %v5362_v30, 0.0  ;;  %v926_v1 = vadd.f32 %v5406_v23, %v837_v31  ;;  %v955_v22 = vmax.f32 %v916_v16, 0.0  ;;  %v5718_v16 = vld [vmem:[#allocation2] sm:$0xff] }
 0x152   : > { %v945_v54 = vmax.f32 %v891_v18, 0.0  ;;  %v894_v40 = vadd.f32 %v893_v24, %v805_v20  ;;  %v956_v11 = vmax.f32 %v5384_v55, 0.0  ;;  %v957_v33 = vmax.f32 %v921_v28, 0.0  ;;  %6431 = vst [vmem:[#allocation9_spill] sm:$0xff] %v5718_v16 }
 0x153   : > { %1755 = vmatpush.bf16.msrb.mxu2 %v1413_v36  ;;  %v806_v43 = vpop.f32.mrf.mxu0  ;;  %v1325_v3 = vmul.f32 0.25, %v953_v9  ;;  %v958_v44 = vmax.f32 %v6426_v17, 0.0  ;;  %v5674_v34 = vmul.f32 0.75, %v953_v9  ;;  %v1326_v2 = vmul.f32 0.25, %v954_v57  ;;  %3525 = vmatmul.msk.bf16.vlgmr.msrb.gmra.mxu0 %vm1700_vm0, %v5718_v16 }
 0x154   : > { %v5648_v0 = vpop.f32.mrf.mxu3  ;;  %v895_v8 = vpop.f32.mrf.mxu1  ;;  %v807_v26 = vadd.f32 %v5322_v48, %v806_v43  ;;  %v5676_v49 = vmul.f32 0.75, %v954_v57  ;;  %v959_v30 = vmax.f32 %v926_v1, 0.0  ;;  %v5678_v37 = vmul.f32 0.25, %v955_v22  ;;  %3509 = vmatmul.msk.bf16.vlgmr.msrb.gmra.mxu3 %vm1700_vm0, %v5718_v16 }
 0x155   : > { %6427 = vst [vmem:[#allocation8_spill] sm:$0xff] %v5674_v34  ;;  %v5680_v23 = vmul.f32 0.75, %v955_v22  ;;  %v1301_v6 = vmul.f32 0.75, %v945_v54  ;;  %v946_v51 = vmax.f32 %v894_v40, 0.0  ;;  %v5684_v55 = vmul.f32 0.25, %v956_v11 }
 0x156   : > { %6428 = vst [vmem:[#allocation24_spill] sm:$0xff] %v5676_v49  ;;  %v5686_v38 = vmul.f32 0.75, %v956_v11  ;;  %v1134_v35 = vadd.f32 %v5322_v48, %v5626_v14  ;;  %v5693_v62 = vmul.f32 0.25, %v957_v33  ;;  %v5695_v50 = vmul.f32 0.75, %v957_v33 }
 0x157   : > { %1756 = vmatpush.bf16.msrb.mxu2 %v1412_v47  ;;  %v5697_v25 = vmul.f32 0.25, %v958_v44  ;;  %v896_v29 = vadd.f32 %v895_v8, %v807_v26  ;;  %v5699_v10 = vmul.f32 0.75, %v958_v44  ;;  %v5701_v46 = vmul.f32 0.25, %v959_v30  ;;  %v6430_v47 = vld [vmem:[#allocation10_spill] sm:$0xff] }
 0x158   : > { %v1277_v56 = vmul.f32 0.25, %v945_v54  ;;  %v5705_v14 = vadd.f32 %v5590_v32, %v6429_v27  ;;  %v5707_v42 = vmul.f32 0.75, %v959_v30  ;;  %v1316_v43 = vpack.c.bf16 %v5597_v19, %v5597_v19 }
 0x159   : > { %v5664_v53 = vpop.f32.mrf.mxu2  ;;  %v1309_v52 = vadd.f32 %v1301_v6, %v6430_v47  ;;  %v1302_v13 = vmul.f32 0.75, %v946_v51  ;;  %v1340_v8 = vpack.c.bf16 %v5600_v58, %v5600_v58  ;;  %v5715_v63 = vadd.f32 %v5633_v61, %v1134_v35  ;;  %v6432_v58 = vld [vmem:[#allocation11_spill] sm:$0xff] }
 0x15a   : > { %v5722_v18 = vadd.f32 %v1325_v3, %v1301_v6  ;;  %v947_v19 = vmax.f32 %v896_v29, 0.0  ;;  %v5725_v20 = vadd.f32 %v5674_v34, %v1277_v56  ;;  %v1278_v9 = vmul.f32 0.25, %v946_v51  ;;  %3493 = vmatmul.msk.bf16.vlgmr.msrb.gmra.mxu2 %vm1700_vm0, %v5718_v16  ;;  %v6439_v29 = vld [vmem:[#allocation17_spill] sm:$0xff]  ;;  %v6445_v34 = vld [vmem:[#allocation22_spill] sm:$0xff] }
 0x15b   : > { %v809_v15 = vpop.f32.mrf.mxu0  ;;  %v5728_v28 = vadd.f32 %v1277_v56, %v6432_v58  ;;  %v1137_v1 = vadd.f32 %v5322_v48, %v5646_v7  ;;  %v1317_v22 = vpack.c.bf16 %v1309_v52, %v1309_v52  ;;  %v5739_v54 = vunpack.c.l.b16 %v1316_v43 }
 0x15c   : > { %v5666_v39 = vpop.f32.mrf.mxu3  ;;  %v898_v12 = vpop.f32.mrf.mxu1  ;;  %v810_v24 = vadd.f32 %v5322_v48, %v809_v15  ;;  %v6433_v15 = vld [vmem:[#allocation12_spill] sm:$0xff]  ;;  %v5744_v17 = vunpack.c.l.b16 %v1340_v8  ;;  %v5746_v44 = vadd.f32 %v1326_v2, %v1302_v13  ;;  %v1303_v26 = vmul.f32 0.75, %v947_v19 }
 0x15d   : > { %v1310_v57 = vadd.f32 %v1302_v13, %v6433_v15  ;;  %v1139_v7 = vadd.f32 %v5322_v48, %v5664_v53  ;;  %v5753_v51 = vadd.f32 %v5676_v49, %v1278_v9  ;;  %v5761_v56 = vadd.f32 %v5648_v0, %v1137_v1  ;;  %v6435_v53 = vld [vmem:[#allocation13_spill] sm:$0xff] }
 0x15e   : > { %v899_v45 = vadd.f32 %v898_v12, %v810_v24  ;;  %6434 = vst [vmem:[#allocation10_spill] sm:$0xff] %v5744_v17  ;;  %v5766_v27 = vunpack.c.l.b16 %v1317_v22  ;;  %v1279_v43 = vmul.f32 0.25, %v947_v19  ;;  %v6444_v0 = vld [vmem:[#allocation21_spill] sm:$0xff] }
 0x15f   : > { %v5774_v15 = vadd.f32 %v5666_v39, %v1139_v7 }
 0x160   : > { %v948_v11 = vmax.f32 %v899_v45, 0.0  ;;  %v6436_v45 = vld [vmem:[#allocation14_spill] sm:$0xff]  ;;  %v5790_v7 = vadd.f32 %v5680_v23, %v1279_v43 }
 0x161   : > { %v5682_v60 = vpop.f32.mrf.mxu2 }
 0x162   : > { %v1304_v47 = vmul.f32 0.75, %v948_v11  ;;  %v1280_v58 = vmul.f32 0.25, %v948_v11  ;;  %v1142_v19 = vadd.f32 %v5322_v48, %v5682_v60 }
 0x163   : > { %v811_v21 = vpop.f32.mrf.mxu0 }
 0x164   : > { %v5691_v59 = vpop.f32.mrf.mxu3  ;;  %v900_v36 = vpop.f32.mrf.mxu1  ;;  %v812_v31 = vadd.f32 %v5322_v48, %v811_v21  ;;  %v1318_v21 = vpack.c.bf16 %v1310_v57, %v1310_v57  ;;  %v5816_v6 = vadd.f32 %v1280_v58, %v6439_v29 }
 0x166   : > { %v901_v3 = vadd.f32 %v900_v36, %v812_v31  ;;  %v5764_v36 = vadd.f32 %v1278_v9, %v6435_v53  ;;  %v5771_v31 = vadd.f32 %v1303_v26, %v6436_v45  ;;  %v5779_v9 = vadd.f32 %v5678_v37, %v1303_v26 }
 0x167   : > { %v5787_v39 = vunpack.c.l.b16 %v1318_v21  ;;  %v5796_v26 = vadd.f32 %v5684_v55, %v1304_v47 }
 0x168   : > { %v949_v52 = vmax.f32 %v901_v3, 0.0 }
 0x169   : > { %v1143_v12 = vpop.f32.mrf.mxu2 }
 0x16a   : > { %v1144_v22 = vadd.f32 %v5322_v48, %v1143_v12  ;;  %v1305_v60 = vmul.f32 0.75, %v949_v52  ;;  %v1281_v61 = vmul.f32 0.25, %v949_v52  ;;  %v5825_v52 = vld [vmem:[#allocation2 + $0x8] sm:$0xff] }
 0x16b   : > { %v814_v30 = vpop.f32.mrf.mxu0  ;;  %6441 = vst [vmem:[#allocation11_spill] sm:$0xff] %v5825_v52  ;;  %3494 = vmatmul.msk.bf16.gmra.mxu2 %vm1700_vm0, %v5825_v52  ;;  %3510 = vmatmul.msk.bf16.gmra.mxu3 %vm1700_vm0, %v5825_v52 }
 0x16c   : > { %v1172_v33 = vpop.f32.mrf.mxu3  ;;  %v815_v35 = vadd.f32 %v5322_v48, %v814_v30  ;;  %v903_v24 = vpop.f32.mrf.mxu1  ;;  %v6437_v30 = vld [vmem:[#allocation16_spill] sm:$0xff]  ;;  %3526 = vmatmul.msk.bf16.gmra.mxu0 %vm1700_vm0, %v5825_v52 }
 0x16d   : > { %v5793_v37 = vadd.f32 %v1304_v47, %v6437_v30  ;;  %v5808_v30 = vadd.f32 %v5691_v59, %v1142_v19  ;;  %v5812_v40 = vadd.f32 %v1172_v33, %v1144_v22  ;;  %v6440_v19 = vld [vmem:[#allocation19_spill] sm:$0xff]  ;;  %v1337_v33 = vadd.f32 %v5693_v62, %v1305_v60 }
 0x16e   : > { %v904_v13 = vadd.f32 %v903_v24, %v815_v35  ;;  %v5799_v24 = vadd.f32 %v5686_v38, %v1280_v58  ;;  %v4805_v58 = vld [vmem:[%s6373_s4] ss:$0 sm:$0xff]  ;;  %v1361_v62 = vadd.f32 %v5695_v50, %v1281_v61 }
 0x170   : > { %v950_v57 = vmax.f32 %v904_v13, 0.0  ;;  %v6438_v13 = vld [vmem:[#allocation15_spill] sm:$0xff] }
 0x171   : > { %v1146_v3 = vpop.f32.mrf.mxu2  ;;  %v5803_v21 = vadd.f32 %v1279_v43, %v6438_v13  ;;  %v1313_v13 = vadd.f32 %v1305_v60, %v6440_v19  ;;  %v6442_v19 = vld [vmem:[#allocation18_spill] sm:$0xff]  ;;  %v1345_v43 = vpack.c.bf16 %v1337_v33, %v1337_v33 }
 0x172   : > { %v1282_v32 = vmul.f32 0.25, %v950_v57  ;;  %v1306_v55 = vmul.f32 0.75, %v950_v57  ;;  %v1147_v22 = vadd.f32 %v4805_v58, %v1146_v3 }
 0x173   : > { %v816_v53 = vpop.f32.mrf.mxu0  ;;  %v1321_v47 = vpack.c.bf16 %v1313_v13, %v1313_v13 }
 0x174   : > { %v1175_v35 = vpop.f32.mrf.mxu3  ;;  %v817_v2 = vadd.f32 %v5322_v48, %v816_v53  ;;  %v905_v57 = vpop.f32.mrf.mxu1  ;;  %v1314_v11 = vadd.f32 %v1306_v55, %v6442_v19  ;;  %v1338_v1 = vadd.f32 %v5697_v25, %v1306_v55  ;;  %v1362_v8 = vadd.f32 %v5699_v10, %v1282_v32  ;;  %v6443_v19 = vld [vmem:[#allocation20_spill] sm:$0xff] }
 0x175   : > { %v1290_v12 = vadd.f32 %v1282_v32, %v6443_v19  ;;  %v1289_v53 = vadd.f32 %v1281_v61, %v6444_v0  ;;  %v1176_v59 = vadd.f32 %v1175_v35, %v1147_v22 }
 0x176   : > { %v906_v29 = vadd.f32 %v905_v57, %v817_v2  ;;  %v1185_v2 = vmax.f32 %v5812_v40, 0.0  ;;  %v1296_v57 = vpack.c.bf16 %v5816_v6, %v5816_v6  ;;  %v1322_v40 = vpack.c.bf16 %v1314_v11, %v1314_v11 }
 0x177   : > { %v1370_v5 = vpack.c.bf16 %v1362_v8, %v1362_v8  ;;  %v1298_v61 = vpack.c.bf16 %v1290_v12, %v1290_v12  ;;  %v1297_v0 = vpack.c.bf16 %v1289_v53, %v1289_v53  ;;  %v1186_v33 = vmax.f32 %v1176_v59, 0.0 }
 0x178   : > { %v951_v60 = vmax.f32 %v906_v29, 0.0  ;;  %v1346_v29 = vpack.c.bf16 %v1338_v1, %v1338_v1  ;;  %v1506_v11 = vunpack.c.l.b16 %v1322_v40  ;;  %v1295_v59 = vpack.c.bf16 %v5803_v21, %v5803_v21 }
 0x179   : > { %v1148_v3 = vpop.f32.mrf.mxu2  ;;  %v1554_v8 = vunpack.c.l.b16 %v1370_v5  ;;  %v1378_v49 = vmul.f32 0.25, %v1186_v33  ;;  %v1377_v5 = vmul.f32 0.25, %v1185_v2  ;;  %v6448_v21 = vpack.c.bf16 %v5799_v24, %v5799_v24 }
 0x17a   : > { %v1149_v25 = vadd.f32 %v4805_v58, %v1148_v3  ;;  %v1283_v45 = vmul.f32 0.25, %v951_v60  ;;  %v1307_v48 = vmul.f32 0.75, %v951_v60  ;;  %v1369_v3 = vpack.c.bf16 %v1361_v62, %v1361_v62 }
 0x17b   : > { %v1530_v1 = vunpack.c.l.b16 %v1346_v29  ;;  %v1505_v62 = vunpack.c.l.b16 %v1321_v47  ;;  %v1552_v2 = vunpack.c.l.b16 %v6448_v21  ;;  %v6452_v24 = vpack.c.bf16 %v5790_v7, %v5790_v7 }
 0x17c   : > { %v1177_v55 = vpop.f32.mrf.mxu3  ;;  %v1315_v6 = vadd.f32 %v1307_v48, %v6445_v34  ;;  %v1339_v17 = vadd.f32 %v5701_v46, %v1307_v48  ;;  %v1363_v58 = vadd.f32 %v5707_v42, %v1283_v45  ;;  %v1291_v32 = vadd.f32 %v1283_v45, %v5575_v41 }
 0x17d   : > { %v1178_v16 = vadd.f32 %v1177_v55, %v1149_v25  ;;  %v1482_v48 = vunpack.c.l.b16 %v1298_v61  ;;  %v6455_v7 = vmax.f32 %v5761_v56, 0.0 }
 0x17e   : > { %v1323_v13 = vpack.c.bf16 %v1315_v6, %v1315_v6  ;;  %v1347_v60 = vpack.c.bf16 %v1339_v17, %v1339_v17  ;;  %v1371_v35 = vpack.c.bf16 %v1363_v58, %v1363_v58  ;;  %v1299_v22 = vpack.c.bf16 %v1291_v32, %v1291_v32  ;;  %v5862_v58 = vld [vmem:[#allocation2 + $0x10] sm:$0xff] }
 0x17f   : > { %v1187_v52 = vmax.f32 %v1178_v16, 0.0  ;;  %v1529_v16 = vunpack.c.l.b16 %v1345_v43  ;;  %v1481_v17 = vunpack.c.l.b16 %v1297_v0  ;;  %v1553_v6 = vunpack.c.l.b16 %v1369_v3  ;;  %3495 = vmatmul.msk.bf16.gmra.mxu2 %vm1700_vm0, %v5862_v58  ;;  %3511 = vmatmul.msk.bf16.gmra.mxu3 %vm1700_vm0, %v5862_v58 }
 0x180   : > { %v1507_v25 = vunpack.c.l.b16 %v1323_v13  ;;  %v1531_v34 = vunpack.c.l.b16 %v1347_v60  ;;  %v1555_v55 = vunpack.c.l.b16 %v1371_v35  ;;  %v1483_v19 = vunpack.c.l.b16 %v1299_v22  ;;  %3527 = vmatmul.msk.bf16.gmra.mxu0 %vm1700_vm0, %v5862_v58 }
 0x181   : > { %v1379_v46 = vmul.f32 0.25, %v1187_v52  ;;  %v6446_v52 = vpack.c.bf16 %v5793_v37, %v5793_v37  ;;  %v6447_v43 = vpack.c.bf16 %v5796_v26, %v5796_v26  ;;  %v1480_v3 = vunpack.c.l.b16 %v1296_v57 }
 0x182   : > { %v1511_v41 = vpack.c.b16 %v1507_v25, %v1506_v11  ;;  %v1535_v12 = vpack.c.b16 %v1531_v34, %v1530_v1  ;;  %v1559_v45 = vpack.c.b16 %v1555_v55, %v1554_v8  ;;  %v1487_v53 = vpack.c.b16 %v1483_v19, %v1482_v48 }
 0x183   : > { %v1387_v40 = vadd.f32 %v1379_v46, %v5707_v42  ;;  %v1504_v47 = vunpack.c.l.b16 %v6446_v52  ;;  %v1528_v29 = vunpack.c.l.b16 %v6447_v43  ;;  %v6449_v42 = vpack.c.bf16 %v5771_v31, %v5771_v31  ;;  %v6465_v52 = vld [vmem:[#allocation10_spill] sm:$0xff] }
 0x184   : > { %2109 = vmatpush.bf16.msra.mxu2 %v1511_v41  ;;  %2198 = vmatpush.bf16.msra.mxu3 %v1535_v12  ;;  %v6450_v37 = vpack.c.bf16 %v5779_v9, %v5779_v9  ;;  %v6451_v26 = vmax.f32 %v5808_v30, 0.0  ;;  %v1386_v13 = vadd.f32 %v1378_v49, %v5699_v10  ;;  %v1486_v57 = vpack.c.b16 %v1481_v17, %v1480_v3  ;;  %v6466_v3 = vld [vmem:[#allocation8_spill] sm:$0xff] }
 0x185   : > { %2020 = vmatpush.bf16.msrb.mxu1 %v1487_v53  ;;  %2287 = vmatpush.bf16.msra.mxu0 %v1559_v45  ;;  %v1503_v32 = vunpack.c.l.b16 %v6449_v42  ;;  %v1510_v60 = vpack.c.b16 %v1505_v62, %v1504_v47  ;;  %v1534_v35 = vpack.c.b16 %v1529_v16, %v1528_v29  ;;  %v1558_v33 = vpack.c.b16 %v1553_v6, %v1552_v2 }
 0x186   : > { %v1527_v61 = vunpack.c.l.b16 %v6450_v37  ;;  %v1376_v0 = vmul.f32 0.25, %v6451_v26  ;;  %v1479_v11 = vunpack.c.l.b16 %v1295_v59  ;;  %v1551_v1 = vunpack.c.l.b16 %v6452_v24  ;;  %v6464_v59 = vld [vmem:[#allocation24_spill] sm:$0xff]  ;;  %v5926_v26 = vld [vmem:[#allocation2 + $0x18] sm:$0xff] }
 0x187   : > { %v6453_v31 = vmax.f32 %v5774_v15, 0.0  ;;  %v1385_v49 = vadd.f32 %v1377_v5, %v5695_v50  ;;  %v1395_v10 = vpack.c.bf16 %v1387_v40, %v1387_v40  ;;  %v6454_v30 = vpack.c.bf16 %v5746_v44, %v5746_v44  ;;  %v6469_v24 = vld [vmem:[#allocation11_spill] sm:$0xff] }
 0x188   : > { %2110 = vmatpush.bf16.msra.mxu2 %v1510_v60  ;;  %2199 = vmatpush.bf16.msra.mxu3 %v1534_v35  ;;  %v1374_v22 = vmul.f32 0.25, %v6455_v7  ;;  %v6456_v25 = vpack.c.bf16 %v5764_v36, %v5764_v36  ;;  %v6457_v15 = vpack.c.bf16 %v5753_v51, %v5753_v51  ;;  %v6458_v55 = vpack.c.bf16 %v5722_v18, %v5722_v18 }
 0x189   : > { %v1375_v9 = vmul.f32 0.25, %v6453_v31  ;;  %v1526_v8 = vunpack.c.l.b16 %v6454_v30  ;;  %2021 = vmatpush.bf16.msrb.mxu1 %v1486_v57  ;;  %2288 = vmatpush.bf16.msra.mxu0 %v1558_v33  ;;  %v1384_v44 = vadd.f32 %v1376_v0, %v5686_v38  ;;  %v1394_v48 = vpack.c.bf16 %v1386_v13, %v1386_v13  ;;  %v6468_v0 = vld [vmem:[#allocation23_spill] sm:$0xff]  ;;  %v5948_v31 = vld [vmem:[#allocation2 + $0x28] sm:$0xff] }
 0x18a   : > { %v1478_v34 = vunpack.c.l.b16 %v6456_v25  ;;  %v1550_v50 = vunpack.c.l.b16 %v6457_v15  ;;  %v1525_v46 = vunpack.c.l.b16 %v6458_v55  ;;  %v1509_v56 = vpack.c.b16 %v1503_v32, %v5787_v39 }
 0x18b   : > { %v1533_v19 = vpack.c.b16 %v1527_v61, %v1526_v8  ;;  %v6459_v16 = vpack.c.bf16 %v5728_v28, %v5728_v28  ;;  %v6460_v41 = vpack.c.bf16 %v5725_v20, %v5725_v20  ;;  %v6461_v12 = vmax.f32 %v5715_v63, 0.0  ;;  %v6467_v61 = vld [vmem:[#allocation9_spill] sm:$0xff] }
 0x18c   : > { %v1485_v62 = vpack.c.b16 %v1479_v11, %v1478_v34  ;;  %v1557_v36 = vpack.c.b16 %v1551_v1, %v1550_v50  ;;  %v1383_v45 = vadd.f32 %v1375_v9, %v5680_v23  ;;  %v1393_v39 = vpack.c.bf16 %v1385_v49, %v1385_v49  ;;  %2111 = vmatpush.bf16.msra.mxu2 %v1509_v56  ;;  %v5938_v1 = vld [vmem:[#allocation2 + $0x20] sm:$0xff]  ;;  %v5958_v9 = vld [vmem:[#allocation2 + $0x30] sm:$0xff]  ;;  %v5968_v49 = vld [vmem:[#allocation2 + $0x38] sm:$0xff] }
 0x18d   : > { %v1477_v51 = vunpack.c.l.b16 %v6459_v16  ;;  %v1549_v18 = vunpack.c.l.b16 %v6460_v41  ;;  %v1373_v38 = vmul.f32 0.25, %v6461_v12  ;;  %v1579_v53 = vunpack.c.l.b16 %v1395_v10  ;;  %2200 = vmatpush.bf16.msra.mxu3 %v1533_v19  ;;  %v5978_v10 = vld [vmem:[#allocation2 + $0x40] sm:$0xff] }
 0x18e   : > { %2022 = vmatpush.bf16.msrb.mxu1 %v1485_v62  ;;  %2289 = vmatpush.bf16.msra.mxu0 %v1557_v36  ;;  %v6462_v17 = vpack.c.bf16 %v5705_v14, %v5705_v14  ;;  %v1508_v6 = vpack.c.b16 %v5766_v27, %v5739_v54  ;;  %v6463_v20 = vpack.c.bf16 %v5604_v4, %v5604_v4  ;;  %v1578_v40 = vunpack.c.l.b16 %v1394_v48 }
 0x18f   : > { %v1382_v5 = vadd.f32 %v1374_v22, %v6464_v59  ;;  %v1392_v23 = vpack.c.bf16 %v1384_v44, %v1384_v44  ;;  %v1532_v47 = vpack.c.b16 %v1525_v46, %v6465_v52  ;;  %v1381_v21 = vadd.f32 %v1373_v38, %v6466_v3  ;;  %3496 = vmatmul.msk.bf16.gmra.mxu2 %vm1700_vm0, %v5926_v26  ;;  %v5994_v46 = vld [vmem:[#allocation2 + $0x48] sm:$0xff]  ;;  %v6020_v59 = vld [vmem:[#allocation2 + $0x58] sm:$0xff] }
 0x190   : > { %v1476_v28 = vunpack.c.l.b16 %v6462_v17  ;;  %v1548_v63 = vunpack.c.l.b16 %v6463_v20  ;;  %v1391_v2 = vpack.c.bf16 %v1383_v45, %v1383_v45  ;;  %v1577_v14 = vunpack.c.l.b16 %v1393_v39  ;;  %2112 = vmatpush.bf16.msra.mxu2 %v1508_v6  ;;  %3512 = vmatmul.msk.bf16.gmra.mxu3 %vm1700_vm0, %v5926_v26 }
 0x191   : > { %2201 = vmatpush.bf16.msra.mxu3 %v1532_v47  ;;  %v1583_v42 = vpack.c.b16 %v1579_v53, %v1578_v40  ;;  %v1390_v54 = vpack.c.bf16 %v1382_v5, %v1382_v5  ;;  %v1576_v4 = vunpack.c.l.b16 %v1392_v23  ;;  %v1389_v27 = vpack.c.bf16 %v1381_v21, %v1381_v21  ;;  %3528 = vmatmul.msk.bf16.gmra.mxu0 %vm1700_vm0, %v5926_v26 }
 0x192   : > { %v1484_v43 = vpack.c.b16 %v1477_v51, %v1476_v28  ;;  %v1556_v29 = vpack.c.b16 %v1549_v18, %v1548_v63  ;;  %v1575_v32 = vunpack.c.l.b16 %v1391_v2  ;;  %v1388_v13 = vpack.c.bf16 %v6468_v0, %v6468_v0  ;;  %v6007_v18 = vld [vmem:[#allocation2 + $0x50] sm:$0xff] }
 0x193   : > { %v1582_v37 = vpack.c.b16 %v1577_v14, %v1576_v4  ;;  %v1574_v60 = vunpack.c.l.b16 %v1390_v54  ;;  %v1573_v35 = vunpack.c.l.b16 %v1389_v27  ;;  %v6034_v54 = vld [vmem:[#allocation2 + $0x60] sm:$0xff] }
 0x194   : > { %2023 = vmatpush.bf16.msrb.mxu1 %v1484_v43  ;;  %2290 = vmatpush.bf16.msra.mxu0 %v1556_v29  ;;  %v1572_v33 = vunpack.c.l.b16 %v1388_v13 }
 0x195   : > { %v1581_v57 = vpack.c.b16 %v1575_v32, %v1574_v60 }
 0x196   : > { %v1580_v11 = vpack.c.b16 %v1573_v35, %v1572_v33 }
 0x197   : > { %3541 = vmatmul.msk.bf16.vlgmr.msrb.gmra.mxu1 %vm1700_vm0, %v6467_v61 }
 0x198   : > { %2376 = vmatpush.bf16.msra.mxu1 %v1583_v42 }
 0x19c   : > { %2377 = vmatpush.bf16.msra.mxu1 %v1582_v37 }
 0x19f   : > { %3497 = vmatmul.msk.bf16.gmra.mxu2 %vm1700_vm0, %v5938_v1 }
 0x1a0   : > { %2378 = vmatpush.bf16.msra.mxu1 %v1581_v57  ;;  %3513 = vmatmul.msk.bf16.gmra.mxu3 %vm1700_vm0, %v5938_v1 }
 0x1a1   : > { %3529 = vmatmul.msk.bf16.gmra.mxu0 %vm1700_vm0, %v5938_v1 }
 0x1a4   : > { %2379 = vmatpush.bf16.msra.mxu1 %v1580_v11 }
 0x1a7   : > { %3542 = vmatmul.msk.bf16.gmra.mxu1 %vm1700_vm0, %v6469_v24 }
 0x1af   : > { %3498 = vmatmul.msk.bf16.gmra.mxu2 %vm1700_vm0, %v5948_v31 }
 0x1b0   : > { %3514 = vmatmul.msk.bf16.gmra.mxu3 %vm1700_vm0, %v5948_v31 }
 0x1b1   : > { %3530 = vmatmul.msk.bf16.gmra.mxu0 %vm1700_vm0, %v5948_v31 }
 0x1b7   : > { %3543 = vmatmul.msk.bf16.gmra.mxu1 %vm1700_vm0, %v5862_v58 }
 0x1bf   : > { %3499 = vmatmul.msk.bf16.gmra.mxu2 %vm1700_vm0, %v5958_v9 }
 0x1c0   : > { %3515 = vmatmul.msk.bf16.gmra.mxu3 %vm1700_vm0, %v5958_v9 }
 0x1c1   : > { %3531 = vmatmul.msk.bf16.gmra.mxu0 %vm1700_vm0, %v5958_v9 }
 0x1c7   : > { %3544 = vmatmul.msk.bf16.gmra.mxu1 %vm1700_vm0, %v5926_v26 }
 0x1cf   : > { %3500 = vmatmul.msk.bf16.gmra.mxu2 %vm1700_vm0, %v5968_v49 }
 0x1d0   : > { %3516 = vmatmul.msk.bf16.gmra.mxu3 %vm1700_vm0, %v5968_v49  ;;  %v1936_v30 = vpop.f32.mrf.mxu0 }
 0x1d1   : > { %3532 = vmatmul.msk.bf16.gmra.mxu0 %vm1700_vm0, %v5968_v49 }
 0x1d7   : > { %3545 = vmatmul.msk.bf16.gmra.mxu1 %vm1700_vm0, %v5938_v1  ;;  %v1847_v7 = vpop.f32.mrf.mxu3 }
 0x1d8   : > { %v1938_v50 = vpop.f32.mrf.mxu0 }
 0x1d9   : > { %v4098_v55 = vpack.c.bf16 %v1938_v50, %v1936_v30 }
 0x1db   : > { %4606 = vst [vmem:[%s5991_s16 + $0x100] sm:$0xff] %v4098_v55  }
 0x1dd   : > { %v1758_v8 = vpop.f32.mrf.mxu2 }
 0x1df   : > { %3501 = vmatmul.msk.bf16.gmra.mxu2 %vm1700_vm0, %v5978_v10  ;;  %v1849_v25 = vpop.f32.mrf.mxu3 }
 0x1e0   : > { %3517 = vmatmul.msk.bf16.gmra.mxu3 %vm1700_vm0, %v5978_v10  ;;  %v4018_v15 = vpack.c.bf16 %v1849_v25, %v1847_v7 }
 0x1e1   : > { %3533 = vmatmul.msk.bf16.gmra.mxu0 %vm1700_vm0, %v5978_v10 }
 0x1e2   : > { %4590 = vst [vmem:[%s5991_s16 + $0x80] sm:$0xff] %v4018_v15  }
 0x1e5   : > { %v1760_v22 = vpop.f32.mrf.mxu2 }
 0x1e6   : > { %v3938_v34 = vpack.c.bf16 %v1760_v22, %v1758_v8  ;;  %v6048_v8 = vld [vmem:[#allocation2 + $0x68] sm:$0xff] }
 0x1e7   : > { %3546 = vmatmul.msk.bf16.gmra.mxu1 %vm1700_vm0, %v5948_v31 }
 0x1e8   : > { %3939 = vst [vmem:[%s5991_s16] sm:$0xff] %v3938_v34  }
 0x1e9   : > { %v1941_v56 = vpop.f32.mrf.mxu0 }
 0x1ee   : > { %v1763_v44 = vpop.f32.mrf.mxu2  ;;  %v1852_v48 = vpop.f32.mrf.mxu3 }
 0x1ef   : > { %3502 = vmatmul.msk.bf16.gmra.mxu2 %vm1700_vm0, %v5994_v46 }
 0x1f0   : > { %3518 = vmatmul.msk.bf16.gmra.mxu3 %vm1700_vm0, %v5994_v46 }
 0x1f1   : > { %3534 = vmatmul.msk.bf16.gmra.mxu0 %vm1700_vm0, %v5994_v46  ;;  %v1943_v51 = vpop.f32.mrf.mxu0 }
 0x1f2   : > { %v4103_v41 = vpack.c.bf16 %v1943_v51, %v1941_v56 }
 0x1f4   : > { %4607 = vst [vmem:[%s5991_s16 + $0x108] sm:$0xff] %v4103_v41  }
 0x1f6   : > { %v1765_v19 = vpop.f32.mrf.mxu2  ;;  %v1854_v62 = vpop.f32.mrf.mxu3 }
 0x1f7   : > { %3547 = vmatmul.msk.bf16.gmra.mxu1 %vm1700_vm0, %v5958_v9  ;;  %v3943_v36 = vpack.c.bf16 %v1765_v19, %v1763_v44  ;;  %v4023_v16 = vpack.c.bf16 %v1854_v62, %v1852_v48 }
 0x1f9   : > { %4575 = vst [vmem:[%s5991_s16 + $0x8] sm:$0xff] %v3943_v36   ;;  %v6062_v36 = vld [vmem:[#allocation2 + $0x70] sm:$0xff] }
 0x1fa   : > { %4591 = vst [vmem:[%s5991_s16 + $0x88] sm:$0xff] %v4023_v16  }
 0x1fd   : > { %v1946_v45 = vpop.f32.mrf.mxu0 }
 0x1ff   : > { %3503 = vmatmul.msk.bf16.gmra.mxu2 %vm1700_vm0, %v6007_v18 }
 0x200   : > { %3519 = vmatmul.msk.bf16.gmra.mxu3 %vm1700_vm0, %v6007_v18 }
 0x201   : > { %3535 = vmatmul.msk.bf16.gmra.mxu0 %vm1700_vm0, %v6007_v18 }
 0x202   : > { %v1768_v12 = vpop.f32.mrf.mxu2  ;;  %v1857_v38 = vpop.f32.mrf.mxu3 }
 0x205   : > { %v1948_v20 = vpop.f32.mrf.mxu0 }
 0x206   : > { %v4108_v63 = vpack.c.bf16 %v1948_v20, %v1946_v45 }
 0x207   : > { %3548 = vmatmul.msk.bf16.gmra.mxu1 %vm1700_vm0, %v5968_v49 }
 0x208   : > { %4608 = vst [vmem:[%s5991_s16 + $0x110] sm:$0xff] %v4108_v63   ;;  %v6076_v63 = vld [vmem:[#allocation2 + $0x78] sm:$0xff] }
 0x20a   : > { %v1770_v53 = vpop.f32.mrf.mxu2  ;;  %v1859_v17 = vpop.f32.mrf.mxu3 }
 0x20b   : > { %v3948_v28 = vpack.c.bf16 %v1770_v53, %v1768_v12  ;;  %v4028_v6 = vpack.c.bf16 %v1859_v17, %v1857_v38 }
 0x20d   : > { %4576 = vst [vmem:[%s5991_s16 + $0x10] sm:$0xff] %v3948_v28  }
 0x20e   : > { %4592 = vst [vmem:[%s5991_s16 + $0x90] sm:$0xff] %v4028_v6   ;;  %v1951_v47 = vpop.f32.mrf.mxu0 }
 0x20f   : > { %3504 = vmatmul.msk.bf16.gmra.mxu2 %vm1700_vm0, %v6020_v59 }
 0x210   : > { %3520 = vmatmul.msk.bf16.gmra.mxu3 %vm1700_vm0, %v6020_v59 }
 0x211   : > { %3536 = vmatmul.msk.bf16.gmra.mxu0 %vm1700_vm0, %v6020_v59 }
 0x212   : > { %v1773_v40 = vpop.f32.mrf.mxu2 }
 0x213   : > { %v1862_v52 = vpop.f32.mrf.mxu3 }
 0x214   : > { %v2025_v39 = vpop.f32.mrf.mxu1 }
 0x216   : > { %v1953_v14 = vpop.f32.mrf.mxu0 }
 0x217   : > { %3549 = vmatmul.msk.bf16.gmra.mxu1 %vm1700_vm0, %v5978_v10  ;;  %v4113_v42 = vpack.c.bf16 %v1953_v14, %v1951_v47 }
 0x219   : > { %4609 = vst [vmem:[%s5991_s16 + $0x118] sm:$0xff] %v4113_v42  }
 0x21a   : > { %v1775_v29 = vpop.f32.mrf.mxu2 }
 0x21b   : > { %v1864_v3 = vpop.f32.mrf.mxu3  ;;  %v3953_v21 = vpack.c.bf16 %v1775_v29, %v1773_v40 }
 0x21c   : > { %v2027_v5 = vpop.f32.mrf.mxu1  ;;  %v4033_v2 = vpack.c.bf16 %v1864_v3, %v1862_v52 }
 0x21d   : > { %v4178_v23 = vpack.c.bf16 %v2027_v5, %v2025_v39  ;;  %4577 = vst [vmem:[%s5991_s16 + $0x18] sm:$0xff] %v3953_v21  }
 0x21e   : > { %4593 = vst [vmem:[%s5991_s16 + $0x98] sm:$0xff] %v4033_v2   ;;  %v1956_v0 = vpop.f32.mrf.mxu0 }
 0x21f   : > { %4622 = vst [vmem:[%s5991_s16 + $0x180] sm:$0xff] %v4178_v23   ;;  %3505 = vmatmul.msk.bf16.gmra.mxu2 %vm1700_vm0, %v6034_v54 }
 0x220   : > { %3521 = vmatmul.msk.bf16.gmra.mxu3 %vm1700_vm0, %v6034_v54 }
 0x221   : > { %3537 = vmatmul.msk.bf16.gmra.mxu0 %vm1700_vm0, %v6034_v54 }
 0x222   : > { %v1778_v32 = vpop.f32.mrf.mxu2 }
 0x223   : > { %v1867_v37 = vpop.f32.mrf.mxu3 }
 0x224   : > { %v2030_v43 = vpop.f32.mrf.mxu1 }
 0x226   : > { %v1958_v11 = vpop.f32.mrf.mxu0 }
 0x227   : > { %3550 = vmatmul.msk.bf16.gmra.mxu1 %vm1700_vm0, %v5994_v46  ;;  %v4118_v30 = vpack.c.bf16 %v1958_v11, %v1956_v0 }
 0x229   : > { %4610 = vst [vmem:[%s5991_s16 + $0x120] sm:$0xff] %v4118_v30  }
 0x22a   : > { %v1780_v60 = vpop.f32.mrf.mxu2 }
 0x22b   : > { %v1869_v35 = vpop.f32.mrf.mxu3  ;;  %v3958_v57 = vpack.c.bf16 %v1780_v60, %v1778_v32 }
 0x22c   : > { %v2032_v4 = vpop.f32.mrf.mxu1  ;;  %v4038_v33 = vpack.c.bf16 %v1869_v35, %v1867_v37 }
 0x22d   : > { %v4183_v27 = vpack.c.bf16 %v2032_v4, %v2030_v43  ;;  %4578 = vst [vmem:[%s5991_s16 + $0x20] sm:$0xff] %v3958_v57  }
 0x22e   : > { %4594 = vst [vmem:[%s5991_s16 + $0xa0] sm:$0xff] %v4038_v33   ;;  %v1961_v15 = vpop.f32.mrf.mxu0 }
 0x22f   : > { %4623 = vst [vmem:[%s5991_s16 + $0x188] sm:$0xff] %v4183_v27   ;;  %3506 = vmatmul.msk.bf16.gmra.mxu2 %vm1700_vm0, %v6048_v8 }
 0x230   : > { %3522 = vmatmul.msk.bf16.gmra.mxu3 %vm1700_vm0, %v6048_v8 }
 0x231   : > { %3538 = vmatmul.msk.bf16.gmra.mxu0 %vm1700_vm0, %v6048_v8 }
 0x232   : > { %v1783_v25 = vpop.f32.mrf.mxu2 }
 0x233   : > { %v1872_v34 = vpop.f32.mrf.mxu3 }
 0x234   : > { %v2035_v13 = vpop.f32.mrf.mxu1 }
 0x236   : > { %v1963_v19 = vpop.f32.mrf.mxu0 }
 0x237   : > { %3551 = vmatmul.msk.bf16.gmra.mxu1 %vm1700_vm0, %v6007_v18  ;;  %v4123_v62 = vpack.c.bf16 %v1963_v19, %v1961_v15 }
 0x239   : > { %4611 = vst [vmem:[%s5991_s16 + $0x128] sm:$0xff] %v4123_v62  }
 0x23a   : > { %v1785_v55 = vpop.f32.mrf.mxu2 }
 0x23b   : > { %v1874_v44 = vpop.f32.mrf.mxu3  ;;  %v3963_v48 = vpack.c.bf16 %v1785_v55, %v1783_v25 }
 0x23c   : > { %v2037_v7 = vpop.f32.mrf.mxu1  ;;  %v4043_v56 = vpack.c.bf16 %v1874_v44, %v1872_v34 }
 0x23d   : > { %v4188_v22 = vpack.c.bf16 %v2037_v7, %v2035_v13  ;;  %4579 = vst [vmem:[%s5991_s16 + $0x28] sm:$0xff] %v3963_v48  }
 0x23e   : > { %4595 = vst [vmem:[%s5991_s16 + $0xa8] sm:$0xff] %v4043_v56   ;;  %v1966_v38 = vpop.f32.mrf.mxu0 }
 0x23f   : > { %4624 = vst [vmem:[%s5991_s16 + $0x190] sm:$0xff] %v4188_v22   ;;  %3507 = vmatmul.msk.bf16.gmra.mxu2 %vm1700_vm0, %v6062_v36 }
 0x240   : > { %3523 = vmatmul.msk.bf16.gmra.mxu3 %vm1700_vm0, %v6062_v36 }
 0x241   : > { %3539 = vmatmul.msk.bf16.gmra.mxu0 %vm1700_vm0, %v6062_v36 }
 0x242   : > { %v1788_v41 = vpop.f32.mrf.mxu2 }
 0x243   : > { %v1877_v12 = vpop.f32.mrf.mxu3 }
 0x244   : > { %v2040_v50 = vpop.f32.mrf.mxu1 }
 0x246   : > { %v1968_v6 = vpop.f32.mrf.mxu0 }
 0x247   : > { %3552 = vmatmul.msk.bf16.gmra.mxu1 %vm1700_vm0, %v6020_v59  ;;  %v4128_v20 = vpack.c.bf16 %v1968_v6, %v1966_v38 }
 0x249   : > { %4612 = vst [vmem:[%s5991_s16 + $0x130] sm:$0xff] %v4128_v20  }
 0x24a   : > { %v1790_v39 = vpop.f32.mrf.mxu2 }
 0x24b   : > { %v1879_v53 = vpop.f32.mrf.mxu3  ;;  %v3968_v17 = vpack.c.bf16 %v1790_v39, %v1788_v41 }
 0x24c   : > { %v2042_v16 = vpop.f32.mrf.mxu1  ;;  %v4048_v28 = vpack.c.bf16 %v1879_v53, %v1877_v12 }
 0x24d   : > { %v4193_v51 = vpack.c.bf16 %v2042_v16, %v2040_v50  ;;  %4580 = vst [vmem:[%s5991_s16 + $0x30] sm:$0xff] %v3968_v17  }
 0x24e   : > { %4596 = vst [vmem:[%s5991_s16 + $0xb0] sm:$0xff] %v4048_v28   ;;  %v1971_v47 = vpop.f32.mrf.mxu0 }
 0x24f   : > { %4625 = vst [vmem:[%s5991_s16 + $0x198] sm:$0xff] %v4193_v51   ;;  %3508 = vmatmul.msk.bf16.gmra.mxu2 %vm1700_vm0, %v6076_v63 }
 0x250   : > { %3524 = vmatmul.msk.bf16.gmra.mxu3 %vm1700_vm0, %v6076_v63 }
 0x251   : > { %3540 = vmatmul.msk.bf16.gmra.mxu0 %vm1700_vm0, %v6076_v63 }
 0x252   : > { %v1793_v40 = vpop.f32.mrf.mxu2 }
 0x253   : > { %v1882_v52 = vpop.f32.mrf.mxu3 }
 0x254   : > { %v2045_v45 = vpop.f32.mrf.mxu1 }
 0x256   : > { %v1973_v14 = vpop.f32.mrf.mxu0 }
 0x257   : > { %3553 = vmatmul.msk.bf16.gmra.mxu1 %vm1700_vm0, %v6034_v54  ;;  %v4133_v42 = vpack.c.bf16 %v1973_v14, %v1971_v47 }
 0x259   : > { %4613 = vst [vmem:[%s5991_s16 + $0x138] sm:$0xff] %v4133_v42  }
 0x25a   : > { %v1795_v29 = vpop.f32.mrf.mxu2 }
 0x25b   : > { %v1884_v3 = vpop.f32.mrf.mxu3  ;;  %v3973_v21 = vpack.c.bf16 %v1795_v29, %v1793_v40 }
 0x25c   : > { %v2047_v5 = vpop.f32.mrf.mxu1  ;;  %v4053_v2 = vpack.c.bf16 %v1884_v3, %v1882_v52 }
 0x25d   : > { %v4198_v23 = vpack.c.bf16 %v2047_v5, %v2045_v45  ;;  %4581 = vst [vmem:[%s5991_s16 + $0x38] sm:$0xff] %v3973_v21  }
 0x25e   : > { %4597 = vst [vmem:[%s5991_s16 + $0xb8] sm:$0xff] %v4053_v2   ;;  %v1976_v0 = vpop.f32.mrf.mxu0 }
 0x25f   : > { %4626 = vst [vmem:[%s5991_s16 + $0x1a0] sm:$0xff] %v4198_v23   ;;  %3557 = vmatmul.msk.bf16.vlgmr.msra.gmra.mxu2 %vm1700_vm0, %v6467_v61 }
 0x260   : > { %3573 = vmatmul.msk.bf16.vlgmr.msra.gmra.mxu3 %vm1700_vm0, %v6467_v61 }
 0x261   : > { %3589 = vmatmul.msk.bf16.vlgmr.msra.gmra.mxu0 %vm1700_vm0, %v6467_v61 }
 0x262   : > { %v1798_v32 = vpop.f32.mrf.mxu2 }
 0x263   : > { %v1887_v37 = vpop.f32.mrf.mxu3 }
 0x264   : > { %v2050_v43 = vpop.f32.mrf.mxu1 }
 0x266   : > { %v1978_v11 = vpop.f32.mrf.mxu0 }
 0x267   : > { %3554 = vmatmul.msk.bf16.gmra.mxu1 %vm1700_vm0, %v6048_v8  ;;  %v4138_v30 = vpack.c.bf16 %v1978_v11, %v1976_v0 }
 0x269   : > { %4614 = vst [vmem:[%s5991_s16 + $0x140] sm:$0xff] %v4138_v30  }
 0x26a   : > { %v1800_v60 = vpop.f32.mrf.mxu2 }
 0x26b   : > { %v1889_v35 = vpop.f32.mrf.mxu3  ;;  %v3978_v57 = vpack.c.bf16 %v1800_v60, %v1798_v32 }
 0x26c   : > { %v2052_v4 = vpop.f32.mrf.mxu1  ;;  %v4058_v33 = vpack.c.bf16 %v1889_v35, %v1887_v37 }
 0x26d   : > { %v4203_v27 = vpack.c.bf16 %v2052_v4, %v2050_v43  ;;  %4582 = vst [vmem:[%s5991_s16 + $0x40] sm:$0xff] %v3978_v57  }
 0x26e   : > { %4598 = vst [vmem:[%s5991_s16 + $0xc0] sm:$0xff] %v4058_v33   ;;  %v1981_v15 = vpop.f32.mrf.mxu0 }
 0x26f   : > { %4627 = vst [vmem:[%s5991_s16 + $0x1a8] sm:$0xff] %v4203_v27   ;;  %3558 = vmatmul.msk.bf16.gmra.mxu2 %vm1700_vm0, %v6469_v24 }
 0x270   : > { %3574 = vmatmul.msk.bf16.gmra.mxu3 %vm1700_vm0, %v6469_v24 }
 0x271   : > { %3590 = vmatmul.msk.bf16.gmra.mxu0 %vm1700_vm0, %v6469_v24 }
 0x272   : > { %v1803_v25 = vpop.f32.mrf.mxu2 }
 0x273   : > { %v1892_v34 = vpop.f32.mrf.mxu3 }
 0x274   : > { %v2055_v13 = vpop.f32.mrf.mxu1 }
 0x276   : > { %v1983_v19 = vpop.f32.mrf.mxu0 }
 0x277   : > { %3555 = vmatmul.msk.bf16.gmra.mxu1 %vm1700_vm0, %v6062_v36  ;;  %v4143_v62 = vpack.c.bf16 %v1983_v19, %v1981_v15 }
 0x279   : > { %4615 = vst [vmem:[%s5991_s16 + $0x148] sm:$0xff] %v4143_v62  }
 0x27a   : > { %v1805_v55 = vpop.f32.mrf.mxu2 }
 0x27b   : > { %v1894_v44 = vpop.f32.mrf.mxu3  ;;  %v3983_v48 = vpack.c.bf16 %v1805_v55, %v1803_v25 }
 0x27c   : > { %v2057_v7 = vpop.f32.mrf.mxu1  ;;  %v4063_v56 = vpack.c.bf16 %v1894_v44, %v1892_v34 }
 0x27d   : > { %v4208_v22 = vpack.c.bf16 %v2057_v7, %v2055_v13  ;;  %4583 = vst [vmem:[%s5991_s16 + $0x48] sm:$0xff] %v3983_v48  }
 0x27e   : > { %4599 = vst [vmem:[%s5991_s16 + $0xc8] sm:$0xff] %v4063_v56   ;;  %v1986_v38 = vpop.f32.mrf.mxu0 }
 0x27f   : > { %4628 = vst [vmem:[%s5991_s16 + $0x1b0] sm:$0xff] %v4208_v22   ;;  %3559 = vmatmul.msk.bf16.gmra.mxu2 %vm1700_vm0, %v5862_v58 }
 0x280   : > { %3575 = vmatmul.msk.bf16.gmra.mxu3 %vm1700_vm0, %v5862_v58 }
 0x281   : > { %3591 = vmatmul.msk.bf16.gmra.mxu0 %vm1700_vm0, %v5862_v58 }
 0x282   : > { %v1808_v41 = vpop.f32.mrf.mxu2 }
 0x283   : > { %v1897_v12 = vpop.f32.mrf.mxu3 }
 0x284   : > { %v2060_v50 = vpop.f32.mrf.mxu1 }
 0x286   : > { %v1988_v6 = vpop.f32.mrf.mxu0 }
 0x287   : > { %3556 = vmatmul.msk.bf16.gmra.mxu1 %vm1700_vm0, %v6076_v63  ;;  %v4148_v20 = vpack.c.bf16 %v1988_v6, %v1986_v38 }
 0x289   : > { %4616 = vst [vmem:[%s5991_s16 + $0x150] sm:$0xff] %v4148_v20  }
 0x28a   : > { %v1810_v39 = vpop.f32.mrf.mxu2 }
 0x28b   : > { %v1899_v53 = vpop.f32.mrf.mxu3  ;;  %v3988_v17 = vpack.c.bf16 %v1810_v39, %v1808_v41 }
 0x28c   : > { %v2062_v16 = vpop.f32.mrf.mxu1  ;;  %v4068_v28 = vpack.c.bf16 %v1899_v53, %v1897_v12 }
 0x28d   : > { %v4213_v51 = vpack.c.bf16 %v2062_v16, %v2060_v50  ;;  %4584 = vst [vmem:[%s5991_s16 + $0x50] sm:$0xff] %v3988_v17  }
 0x28e   : > { %4600 = vst [vmem:[%s5991_s16 + $0xd0] sm:$0xff] %v4068_v28  }
 0x28f   : > { %4629 = vst [vmem:[%s5991_s16 + $0x1b8] sm:$0xff] %v4213_v51   ;;  %3560 = vmatmul.msk.bf16.gmra.mxu2 %vm1700_vm0, %v5926_v26 }
 0x290   : > { %3576 = vmatmul.msk.bf16.gmra.mxu3 %vm1700_vm0, %v5926_v26 }
 0x291   : > { %3592 = vmatmul.msk.bf16.gmra.mxu0 %vm1700_vm0, %v5926_v26 }
 0x292   : > { %v1813_v40 = vpop.f32.mrf.mxu2 }
 0x293   : > { %v1902_v52 = vpop.f32.mrf.mxu3 }
 0x294   : > { %v2065_v45 = vpop.f32.mrf.mxu1 }
 0x297   : > { %3605 = vmatmul.msk.bf16.vlgmr.msra.gmra.mxu1 %vm1700_vm0, %v6467_v61  ;;  %v1991_v61 = vpop.f32.mrf.mxu0 }
 0x29a   : > { %v1815_v43 = vpop.f32.mrf.mxu2 }
 0x29b   : > { %v1904_v29 = vpop.f32.mrf.mxu3  ;;  %v3993_v3 = vpack.c.bf16 %v1815_v43, %v1813_v40 }
 0x29c   : > { %v2067_v5 = vpop.f32.mrf.mxu1  ;;  %v4073_v21 = vpack.c.bf16 %v1904_v29, %v1902_v52 }
 0x29d   : > { %v4218_v23 = vpack.c.bf16 %v2067_v5, %v2065_v45  ;;  %4585 = vst [vmem:[%s5991_s16 + $0x58] sm:$0xff] %v3993_v3  }
 0x29e   : > { %4601 = vst [vmem:[%s5991_s16 + $0xd8] sm:$0xff] %v4073_v21  }
 0x29f   : > { %4630 = vst [vmem:[%s5991_s16 + $0x1c0] sm:$0xff] %v4218_v23   ;;  %v1993_v2 = vpop.f32.mrf.mxu0  ;;  %3561 = vmatmul.msk.bf16.gmra.mxu2 %vm1700_vm0, %v5938_v1 }
 0x2a0   : > { %v4153_v14 = vpack.c.bf16 %v1993_v2, %v1991_v61  ;;  %3577 = vmatmul.msk.bf16.gmra.mxu3 %vm1700_vm0, %v5938_v1 }
 0x2a1   : > { %3593 = vmatmul.msk.bf16.gmra.mxu0 %vm1700_vm0, %v5938_v1 }
 0x2a2   : > { %4617 = vst [vmem:[%s5991_s16 + $0x158] sm:$0xff] %v4153_v14   ;;  %v1818_v27 = vpop.f32.mrf.mxu2 }
 0x2a3   : > { %v1907_v32 = vpop.f32.mrf.mxu3 }
 0x2a4   : > { %v2070_v47 = vpop.f32.mrf.mxu1 }
 0x2a7   : > { %3606 = vmatmul.msk.bf16.gmra.mxu1 %vm1700_vm0, %v6469_v24  ;;  %v1996_v24 = vpop.f32.mrf.mxu0 }
 0x2aa   : > { %v1820_v0 = vpop.f32.mrf.mxu2 }
 0x2ab   : > { %v1909_v13 = vpop.f32.mrf.mxu3  ;;  %v3998_v60 = vpack.c.bf16 %v1820_v0, %v1818_v27 }
 0x2ac   : > { %v2072_v42 = vpop.f32.mrf.mxu1  ;;  %v4078_v35 = vpack.c.bf16 %v1909_v13, %v1907_v32 }
 0x2ad   : > { %v4223_v4 = vpack.c.bf16 %v2072_v42, %v2070_v47  ;;  %4586 = vst [vmem:[%s5991_s16 + $0x60] sm:$0xff] %v3998_v60  }
 0x2ae   : > { %4602 = vst [vmem:[%s5991_s16 + $0xe0] sm:$0xff] %v4078_v35  }
 0x2af   : > { %4631 = vst [vmem:[%s5991_s16 + $0x1c8] sm:$0xff] %v4223_v4   ;;  %v1998_v57 = vpop.f32.mrf.mxu0  ;;  %3562 = vmatmul.msk.bf16.gmra.mxu2 %vm1700_vm0, %v5948_v31 }
 0x2b0   : > { %v4158_v33 = vpack.c.bf16 %v1998_v57, %v1996_v24  ;;  %3578 = vmatmul.msk.bf16.gmra.mxu3 %vm1700_vm0, %v5948_v31 }
 0x2b1   : > { %3594 = vmatmul.msk.bf16.gmra.mxu0 %vm1700_vm0, %v5948_v31 }
 0x2b2   : > { %4618 = vst [vmem:[%s5991_s16 + $0x160] sm:$0xff] %v4158_v33   ;;  %v1823_v7 = vpop.f32.mrf.mxu2 }
 0x2b3   : > { %v1912_v22 = vpop.f32.mrf.mxu3 }
 0x2b4   : > { %v2075_v37 = vpop.f32.mrf.mxu1 }
 0x2b7   : > { %3607 = vmatmul.msk.bf16.gmra.mxu1 %vm1700_vm0, %v5862_v58  ;;  %v2001_v58 = vpop.f32.mrf.mxu0 }
 0x2ba   : > { %v1825_v34 = vpop.f32.mrf.mxu2 }
 0x2bb   : > { %v1914_v15 = vpop.f32.mrf.mxu3  ;;  %v4003_v50 = vpack.c.bf16 %v1825_v34, %v1823_v7 }
 0x2bc   : > { %v2077_v11 = vpop.f32.mrf.mxu1  ;;  %v4083_v55 = vpack.c.bf16 %v1914_v15, %v1912_v22 }
 0x2bd   : > { %v4228_v30 = vpack.c.bf16 %v2077_v11, %v2075_v37  ;;  %4587 = vst [vmem:[%s5991_s16 + $0x68] sm:$0xff] %v4003_v50  }
 0x2be   : > { %4603 = vst [vmem:[%s5991_s16 + $0xe8] sm:$0xff] %v4083_v55  }
 0x2bf   : > { %4632 = vst [vmem:[%s5991_s16 + $0x1d0] sm:$0xff] %v4228_v30   ;;  %v2003_v44 = vpop.f32.mrf.mxu0  ;;  %3563 = vmatmul.msk.bf16.gmra.mxu2 %vm1700_vm0, %v5958_v9 }
 0x2c0   : > { %v4163_v48 = vpack.c.bf16 %v2003_v44, %v2001_v58  ;;  %3579 = vmatmul.msk.bf16.gmra.mxu3 %vm1700_vm0, %v5958_v9 }
 0x2c1   : > { %3595 = vmatmul.msk.bf16.gmra.mxu0 %vm1700_vm0, %v5958_v9 }
 0x2c2   : > { %4619 = vst [vmem:[%s5991_s16 + $0x168] sm:$0xff] %v4163_v48   ;;  %v1828_v62 = vpop.f32.mrf.mxu2 }
 0x2c3   : > { %v1917_v16 = vpop.f32.mrf.mxu3 }
 0x2c4   : > { %v2080_v25 = vpop.f32.mrf.mxu1 }
 0x2c7   : > { %3608 = vmatmul.msk.bf16.gmra.mxu1 %vm1700_vm0, %v5926_v26  ;;  %v2006_v26 = vpop.f32.mrf.mxu0 }
 0x2ca   : > { %v1830_v41 = vpop.f32.mrf.mxu2 }
 0x2cb   : > { %v1919_v12 = vpop.f32.mrf.mxu3  ;;  %v4008_v38 = vpack.c.bf16 %v1830_v41, %v1828_v62 }
 0x2cc   : > { %v2082_v56 = vpop.f32.mrf.mxu1  ;;  %v4088_v45 = vpack.c.bf16 %v1919_v12, %v1917_v16 }
 0x2cd   : > { %v4233_v19 = vpack.c.bf16 %v2082_v56, %v2080_v25  ;;  %4588 = vst [vmem:[%s5991_s16 + $0x70] sm:$0xff] %v4008_v38  }
 0x2ce   : > { %4604 = vst [vmem:[%s5991_s16 + $0xf0] sm:$0xff] %v4088_v45  }
 0x2cf   : > { %4633 = vst [vmem:[%s5991_s16 + $0x1d8] sm:$0xff] %v4233_v19   ;;  %v2008_v39 = vpop.f32.mrf.mxu0  ;;  %3564 = vmatmul.msk.bf16.gmra.mxu2 %vm1700_vm0, %v5968_v49 }
 0x2d0   : > { %v4168_v53 = vpack.c.bf16 %v2008_v39, %v2006_v26  ;;  %3580 = vmatmul.msk.bf16.gmra.mxu3 %vm1700_vm0, %v5968_v49 }
 0x2d1   : > { %3596 = vmatmul.msk.bf16.gmra.mxu0 %vm1700_vm0, %v5968_v49 }
 0x2d2   : > { %4620 = vst [vmem:[%s5991_s16 + $0x170] sm:$0xff] %v4168_v53   ;;  %v1833_v6 = vpop.f32.mrf.mxu2 }
 0x2d3   : > { %v1922_v20 = vpop.f32.mrf.mxu3 }
 0x2d4   : > { %v2085_v51 = vpop.f32.mrf.mxu1 }
 0x2d7   : > { %3609 = vmatmul.msk.bf16.gmra.mxu1 %vm1700_vm0, %v5938_v1  ;;  %v2011_v1 = vpop.f32.mrf.mxu0 }
 0x2da   : > { %v1835_v23 = vpop.f32.mrf.mxu2 }
 0x2db   : > { %v1924_v40 = vpop.f32.mrf.mxu3  ;;  %v4013_v52 = vpack.c.bf16 %v1835_v23, %v1833_v6 }
 0x2dc   : > { %v2087_v17 = vpop.f32.mrf.mxu1  ;;  %v4093_v61 = vpack.c.bf16 %v1924_v40, %v1922_v20 }
 0x2dd   : > { %v4238_v28 = vpack.c.bf16 %v2087_v17, %v2085_v51  ;;  %4589 = vst [vmem:[%s5991_s16 + $0x78] sm:$0xff] %v4013_v52  }
 0x2de   : > { %4605 = vst [vmem:[%s5991_s16 + $0xf8] sm:$0xff] %v4093_v61  }
 0x2df   : > { %4634 = vst [vmem:[%s5991_s16 + $0x1e0] sm:$0xff] %v4238_v28   ;;  %v2013_v47 = vpop.f32.mrf.mxu0  ;;  %3565 = vmatmul.msk.bf16.gmra.mxu2 %vm1700_vm0, %v5978_v10 }
 0x2e0   : > { %v4173_v43 = vpack.c.bf16 %v2013_v47, %v2011_v1  ;;  %3581 = vmatmul.msk.bf16.gmra.mxu3 %vm1700_vm0, %v5978_v10 }
 0x2e1   : > { %3597 = vmatmul.msk.bf16.gmra.mxu0 %vm1700_vm0, %v5978_v10 }
 0x2e2   : > { %4621 = vst [vmem:[%s5991_s16 + $0x178] sm:$0xff] %v4173_v43   ;;  %v2114_v21 = vpop.f32.mrf.mxu2 }
 0x2e3   : > { %v2203_v2 = vpop.f32.mrf.mxu3 }
 0x2e4   : > { %v2090_v5 = vpop.f32.mrf.mxu1 }
 0x2e7   : > { %3610 = vmatmul.msk.bf16.gmra.mxu1 %vm1700_vm0, %v5948_v31  ;;  %v2292_v31 = vpop.f32.mrf.mxu0 }
 0x2ea   : > { %v2116_v42 = vpop.f32.mrf.mxu2 }
 0x2eb   : > { %v2205_v4 = vpop.f32.mrf.mxu3  ;;  %v4258_v27 = vpack.c.bf16 %v2116_v42, %v2114_v21 }
 0x2ec   : > { %v2092_v29 = vpop.f32.mrf.mxu1  ;;  %v4338_v32 = vpack.c.bf16 %v2205_v4, %v2203_v2 }
 0x2ed   : > { %v4243_v3 = vpack.c.bf16 %v2092_v29, %v2090_v5  ;;  %4638 = vst [vmem:[%s5991_s16 + $0x200] sm:$0xff] %v4258_v27  }
 0x2ee   : > { %4654 = vst [vmem:[%s5991_s16 + $0x280] sm:$0xff] %v4338_v32  }
 0x2ef   : > { %4635 = vst [vmem:[%s5991_s16 + $0x1e8] sm:$0xff] %v4243_v3   ;;  %v2294_v24 = vpop.f32.mrf.mxu0  ;;  %3566 = vmatmul.msk.bf16.gmra.mxu2 %vm1700_vm0, %v5994_v46 }
 0x2f0   : > { %v4418_v37 = vpack.c.bf16 %v2294_v24, %v2292_v31  ;;  %3582 = vmatmul.msk.bf16.gmra.mxu3 %vm1700_vm0, %v5994_v46 }
 0x2f1   : > { %3598 = vmatmul.msk.bf16.gmra.mxu0 %vm1700_vm0, %v5994_v46 }
 0x2f2   : > { %4670 = vst [vmem:[%s5991_s16 + $0x300] sm:$0xff] %v4418_v37   ;;  %v2119_v60 = vpop.f32.mrf.mxu2 }
 0x2f3   : > { %v2208_v35 = vpop.f32.mrf.mxu3 }
 0x2f4   : > { %v2095_v14 = vpop.f32.mrf.mxu1 }
 0x2f7   : > { %3611 = vmatmul.msk.bf16.gmra.mxu1 %vm1700_vm0, %v5958_v9  ;;  %v2297_v9 = vpop.f32.mrf.mxu0 }
 0x2fa   : > { %v2121_v33 = vpop.f32.mrf.mxu2 }
 0x2fb   : > { %v2210_v11 = vpop.f32.mrf.mxu3  ;;  %v4263_v30 = vpack.c.bf16 %v2121_v33, %v2119_v60 }
 0x2fc   : > { %v2097_v0 = vpop.f32.mrf.mxu1  ;;  %v4343_v7 = vpack.c.bf16 %v2210_v11, %v2208_v35 }
 0x2fd   : > { %v4248_v13 = vpack.c.bf16 %v2097_v0, %v2095_v14  ;;  %4639 = vst [vmem:[%s5991_s16 + $0x208] sm:$0xff] %v4263_v30  }
 0x2fe   : > { %4655 = vst [vmem:[%s5991_s16 + $0x288] sm:$0xff] %v4343_v7  }
 0x2ff   : > { %4636 = vst [vmem:[%s5991_s16 + $0x1f0] sm:$0xff] %v4248_v13   ;;  %v2299_v22 = vpop.f32.mrf.mxu0  ;;  %3567 = vmatmul.msk.bf16.gmra.mxu2 %vm1700_vm0, %v6007_v18 }
 0x300   : > { %v4423_v58 = vpack.c.bf16 %v2299_v22, %v2297_v9  ;;  %3583 = vmatmul.msk.bf16.gmra.mxu3 %vm1700_vm0, %v6007_v18 }
 0x301   : > { %3599 = vmatmul.msk.bf16.gmra.mxu0 %vm1700_vm0, %v6007_v18 }
 0x302   : > { %4671 = vst [vmem:[%s5991_s16 + $0x308] sm:$0xff] %v4423_v58   ;;  %v2124_v15 = vpop.f32.mrf.mxu2 }
 0x303   : > { %v2213_v50 = vpop.f32.mrf.mxu3 }
 0x304   : > { %v2100_v57 = vpop.f32.mrf.mxu1 }
 0x307   : > { %3612 = vmatmul.msk.bf16.gmra.mxu1 %vm1700_vm0, %v5968_v49  ;;  %v2302_v49 = vpop.f32.mrf.mxu0 }
 0x30a   : > { %v2126_v44 = vpop.f32.mrf.mxu2 }
 0x30b   : > { %v2215_v48 = vpop.f32.mrf.mxu3  ;;  %v4268_v56 = vpack.c.bf16 %v2126_v44, %v2124_v15 }
 0x30c   : > { %v2102_v25 = vpop.f32.mrf.mxu1  ;;  %v4348_v19 = vpack.c.bf16 %v2215_v48, %v2213_v50 }
 0x30d   : > { %v4253_v34 = vpack.c.bf16 %v2102_v25, %v2100_v57  ;;  %4640 = vst [vmem:[%s5991_s16 + $0x210] sm:$0xff] %v4268_v56  }
 0x30e   : > { %4656 = vst [vmem:[%s5991_s16 + $0x290] sm:$0xff] %v4348_v19  }
 0x30f   : > { %4637 = vst [vmem:[%s5991_s16 + $0x1f8] sm:$0xff] %v4253_v34   ;;  %v2304_v62 = vpop.f32.mrf.mxu0  ;;  %3568 = vmatmul.msk.bf16.gmra.mxu2 %vm1700_vm0, %v6020_v59 }
 0x310   : > { %v4428_v16 = vpack.c.bf16 %v2304_v62, %v2302_v49  ;;  %3584 = vmatmul.msk.bf16.gmra.mxu3 %vm1700_vm0, %v6020_v59 }
 0x311   : > { %3600 = vmatmul.msk.bf16.gmra.mxu0 %vm1700_vm0, %v6020_v59 }
 0x312   : > { %4672 = vst [vmem:[%s5991_s16 + $0x310] sm:$0xff] %v4428_v16   ;;  %v2129_v41 = vpop.f32.mrf.mxu2 }
 0x313   : > { %v2218_v12 = vpop.f32.mrf.mxu3 }
 0x314   : > { %v2381_v55 = vpop.f32.mrf.mxu1 }
 0x317   : > { %3613 = vmatmul.msk.bf16.gmra.mxu1 %vm1700_vm0, %v5978_v10  ;;  %v2307_v10 = vpop.f32.mrf.mxu0 }
 0x31a   : > { %v2131_v45 = vpop.f32.mrf.mxu2 }
 0x31b   : > { %v2220_v39 = vpop.f32.mrf.mxu3  ;;  %v4273_v53 = vpack.c.bf16 %v2131_v45, %v2129_v41 }
 0x31c   : > { %v2383_v26 = vpop.f32.mrf.mxu1  ;;  %v4353_v17 = vpack.c.bf16 %v2220_v39, %v2218_v12 }
 0x31d   : > { %v4498_v51 = vpack.c.bf16 %v2383_v26, %v2381_v55  ;;  %4641 = vst [vmem:[%s5991_s16 + $0x218] sm:$0xff] %v4273_v53  }
 0x31e   : > { %4657 = vst [vmem:[%s5991_s16 + $0x298] sm:$0xff] %v4353_v17  }
 0x31f   : > { %4686 = vst [vmem:[%s5991_s16 + $0x380] sm:$0xff] %v4498_v51   ;;  %v2309_v28 = vpop.f32.mrf.mxu0  ;;  %3569 = vmatmul.msk.bf16.gmra.mxu2 %vm1700_vm0, %v6034_v54 }
 0x320   : > { %v4433_v6 = vpack.c.bf16 %v2309_v28, %v2307_v10  ;;  %3585 = vmatmul.msk.bf16.gmra.mxu3 %vm1700_vm0, %v6034_v54 }
 0x321   : > { %3601 = vmatmul.msk.bf16.gmra.mxu0 %vm1700_vm0, %v6034_v54 }
 0x322   : > { %4673 = vst [vmem:[%s5991_s16 + $0x318] sm:$0xff] %v4433_v6   ;;  %v2134_v5 = vpop.f32.mrf.mxu2 }
 0x323   : > { %v2223_v23 = vpop.f32.mrf.mxu3 }
 0x324   : > { %v2386_v38 = vpop.f32.mrf.mxu1 }
 0x327   : > { %3614 = vmatmul.msk.bf16.gmra.mxu1 %vm1700_vm0, %v5994_v46  ;;  %v2312_v46 = vpop.f32.mrf.mxu0 }
 0x32a   : > { %v2136_v52 = vpop.f32.mrf.mxu2 }
 0x32b   : > { %v2225_v61 = vpop.f32.mrf.mxu3  ;;  %v4278_v47 = vpack.c.bf16 %v2136_v52, %v2134_v5 }
 0x32c   : > { %v2388_v20 = vpop.f32.mrf.mxu1  ;;  %v4358_v43 = vpack.c.bf16 %v2225_v61, %v2223_v23 }
 0x32d   : > { %v4503_v1 = vpack.c.bf16 %v2388_v20, %v2386_v38  ;;  %4642 = vst [vmem:[%s5991_s16 + $0x220] sm:$0xff] %v4278_v47  }
 0x32e   : > { %4658 = vst [vmem:[%s5991_s16 + $0x2a0] sm:$0xff] %v4358_v43  }
 0x32f   : > { %4687 = vst [vmem:[%s5991_s16 + $0x388] sm:$0xff] %v4503_v1   ;;  %v2314_v29 = vpop.f32.mrf.mxu0  ;;  %3570 = vmatmul.msk.bf16.gmra.mxu2 %vm1700_vm0, %v6048_v8 }
 0x330   : > { %v4438_v3 = vpack.c.bf16 %v2314_v29, %v2312_v46  ;;  %3586 = vmatmul.msk.bf16.gmra.mxu3 %vm1700_vm0, %v6048_v8 }
 0x331   : > { %3602 = vmatmul.msk.bf16.gmra.mxu0 %vm1700_vm0, %v6048_v8 }
 0x332   : > { %4674 = vst [vmem:[%s5991_s16 + $0x320] sm:$0xff] %v4438_v3   ;;  %v2139_v31 = vpop.f32.mrf.mxu2 }
 0x333   : > { %v2228_v14 = vpop.f32.mrf.mxu3 }
 0x334   : > { %v2391_v40 = vpop.f32.mrf.mxu1 }
 0x337   : > { %3615 = vmatmul.msk.bf16.gmra.mxu1 %vm1700_vm0, %v6007_v18  ;;  %v2317_v18 = vpop.f32.mrf.mxu0 }
 0x33a   : > { %v2141_v4 = vpop.f32.mrf.mxu2 }
 0x33b   : > { %v2230_v27 = vpop.f32.mrf.mxu3  ;;  %v4283_v32 = vpack.c.bf16 %v2141_v4, %v2139_v31 }
 0x33c   : > { %v2393_v21 = vpop.f32.mrf.mxu1  ;;  %v4363_v24 = vpack.c.bf16 %v2230_v27, %v2228_v14 }
 0x33d   : > { %v4508_v2 = vpack.c.bf16 %v2393_v21, %v2391_v40  ;;  %4643 = vst [vmem:[%s5991_s16 + $0x228] sm:$0xff] %v4283_v32  }
 0x33e   : > { %4659 = vst [vmem:[%s5991_s16 + $0x2a8] sm:$0xff] %v4363_v24  }
 0x33f   : > { %4688 = vst [vmem:[%s5991_s16 + $0x390] sm:$0xff] %v4508_v2   ;;  %v2319_v37 = vpop.f32.mrf.mxu0  ;;  %3571 = vmatmul.msk.bf16.gmra.mxu2 %vm1700_vm0, %v6062_v36 }
 0x340   : > { %v4443_v0 = vpack.c.bf16 %v2319_v37, %v2317_v18  ;;  %3587 = vmatmul.msk.bf16.gmra.mxu3 %vm1700_vm0, %v6062_v36 }
 0x341   : > { %3603 = vmatmul.msk.bf16.gmra.mxu0 %vm1700_vm0, %v6062_v36 }
 0x342   : > { %4675 = vst [vmem:[%s5991_s16 + $0x328] sm:$0xff] %v4443_v0   ;;  %v2144_v35 = vpop.f32.mrf.mxu2 }
 0x343   : > { %v2233_v9 = vpop.f32.mrf.mxu3 }
 0x344   : > { %v2396_v42 = vpop.f32.mrf.mxu1 }
 0x347   : > { %3616 = vmatmul.msk.bf16.gmra.mxu1 %vm1700_vm0, %v6020_v59  ;;  %v2322_v59 = vpop.f32.mrf.mxu0 }
 0x34a   : > { %v2146_v33 = vpop.f32.mrf.mxu2 }
 0x34b   : > { %v2235_v11 = vpop.f32.mrf.mxu3  ;;  %v4288_v30 = vpack.c.bf16 %v2146_v33, %v2144_v35 }
 0x34c   : > { %v2398_v13 = vpop.f32.mrf.mxu1  ;;  %v4368_v7 = vpack.c.bf16 %v2235_v11, %v2233_v9 }
 0x34d   : > { %v4513_v60 = vpack.c.bf16 %v2398_v13, %v2396_v42  ;;  %4644 = vst [vmem:[%s5991_s16 + $0x230] sm:$0xff] %v4288_v30  }
 0x34e   : > { %4660 = vst [vmem:[%s5991_s16 + $0x2b0] sm:$0xff] %v4368_v7  }
 0x34f   : > { %4689 = vst [vmem:[%s5991_s16 + $0x398] sm:$0xff] %v4513_v60   ;;  %v2324_v22 = vpop.f32.mrf.mxu0  ;;  %3572 = vmatmul.msk.bf16.gmra.mxu2 %vm1700_vm0, %v6076_v63 }
 0x350   : > { %v4448_v58 = vpack.c.bf16 %v2324_v22, %v2322_v59  ;;  %3588 = vmatmul.msk.bf16.gmra.mxu3 %vm1700_vm0, %v6076_v63 }
 0x351   : > { %3604 = vmatmul.msk.bf16.gmra.mxu0 %vm1700_vm0, %v6076_v63 }
 0x352   : > { %4676 = vst [vmem:[%s5991_s16 + $0x330] sm:$0xff] %v4448_v58   ;;  %v2149_v15 = vpop.f32.mrf.mxu2 }
 0x353   : > { %v2238_v50 = vpop.f32.mrf.mxu3 }
 0x354   : > { %v2401_v57 = vpop.f32.mrf.mxu1 }
 0x357   : > { %3617 = vmatmul.msk.bf16.gmra.mxu1 %vm1700_vm0, %v6034_v54  ;;  %v2327_v54 = vpop.f32.mrf.mxu0 }
 0x35a   : > { %v2151_v55 = vpop.f32.mrf.mxu2 }
 0x35b   : > { %v2240_v44 = vpop.f32.mrf.mxu3  ;;  %v4293_v48 = vpack.c.bf16 %v2151_v55, %v2149_v15 }
 0x35c   : > { %v2403_v25 = vpop.f32.mrf.mxu1  ;;  %v4373_v56 = vpack.c.bf16 %v2240_v44, %v2238_v50 }
 0x35d   : > { %v4518_v34 = vpack.c.bf16 %v2403_v25, %v2401_v57  ;;  %4645 = vst [vmem:[%s5991_s16 + $0x238] sm:$0xff] %v4293_v48  }
 0x35e   : > { %4661 = vst [vmem:[%s5991_s16 + $0x2b8] sm:$0xff] %v4373_v56  }
 0x35f   : > { %4690 = vst [vmem:[%s5991_s16 + $0x3a0] sm:$0xff] %v4518_v34   ;;  %v2329_v19 = vpop.f32.mrf.mxu0 }
 0x360   : > { %v4453_v62 = vpack.c.bf16 %v2329_v19, %v2327_v54 }
 0x362   : > { %4677 = vst [vmem:[%s5991_s16 + $0x338] sm:$0xff] %v4453_v62   ;;  %v2154_v51 = vpop.f32.mrf.mxu2 }
 0x363   : > { %v2243_v41 = vpop.f32.mrf.mxu3 }
 0x364   : > { %v2406_v49 = vpop.f32.mrf.mxu1 }
 0x367   : > { %3618 = vmatmul.msk.bf16.gmra.mxu1 %vm1700_vm0, %v6048_v8  ;;  %v2332_v12 = vpop.f32.mrf.mxu0 }
 0x36a   : > { %v2156_v38 = vpop.f32.mrf.mxu2 }
 0x36b   : > { %v2245_v45 = vpop.f32.mrf.mxu3  ;;  %v4298_v39 = vpack.c.bf16 %v2156_v38, %v2154_v51 }
 0x36c   : > { %v2408_v16 = vpop.f32.mrf.mxu1  ;;  %v4378_v53 = vpack.c.bf16 %v2245_v45, %v2243_v41 }
 0x36d   : > { %v4523_v26 = vpack.c.bf16 %v2408_v16, %v2406_v49  ;;  %4646 = vst [vmem:[%s5991_s16 + $0x240] sm:$0xff] %v4298_v39  }
 0x36e   : > { %4662 = vst [vmem:[%s5991_s16 + $0x2c0] sm:$0xff] %v4378_v53  }
 0x36f   : > { %4691 = vst [vmem:[%s5991_s16 + $0x3a8] sm:$0xff] %v4523_v26   ;;  %v2334_v8 = vpop.f32.mrf.mxu0 }
 0x370   : > { %v4458_v17 = vpack.c.bf16 %v2334_v8, %v2332_v12 }
 0x372   : > { %4678 = vst [vmem:[%s5991_s16 + $0x340] sm:$0xff] %v4458_v17   ;;  %v2159_v20 = vpop.f32.mrf.mxu2 }
 0x373   : > { %v2248_v1 = vpop.f32.mrf.mxu3 }
 0x374   : > { %v2411_v10 = vpop.f32.mrf.mxu1 }
 0x377   : > { %3619 = vmatmul.msk.bf16.gmra.mxu1 %vm1700_vm0, %v6062_v36  ;;  %v2337_v5 = vpop.f32.mrf.mxu0 }
 0x37a   : > { %v2161_v46 = vpop.f32.mrf.mxu2 }
 0x37b   : > { %v2250_v40 = vpop.f32.mrf.mxu3  ;;  %v4303_v52 = vpack.c.bf16 %v2161_v46, %v2159_v20 }
 0x37c   : > { %v2413_v28 = vpop.f32.mrf.mxu1  ;;  %v4383_v61 = vpack.c.bf16 %v2250_v40, %v2248_v1 }
 0x37d   : > { %v4528_v6 = vpack.c.bf16 %v2413_v28, %v2411_v10  ;;  %4647 = vst [vmem:[%s5991_s16 + $0x248] sm:$0xff] %v4303_v52  }
 0x37e   : > { %4663 = vst [vmem:[%s5991_s16 + $0x2c8] sm:$0xff] %v4383_v61  }
 0x37f   : > { %4692 = vst [vmem:[%s5991_s16 + $0x3b0] sm:$0xff] %v4528_v6   ;;  %v2339_v36 = vpop.f32.mrf.mxu0 }
 0x380   : > { %v4463_v47 = vpack.c.bf16 %v2339_v36, %v2337_v5 }
 0x382   : > { %4679 = vst [vmem:[%s5991_s16 + $0x348] sm:$0xff] %v4463_v47   ;;  %v2164_v3 = vpop.f32.mrf.mxu2 }
 0x383   : > { %v2253_v21 = vpop.f32.mrf.mxu3 }
 0x384   : > { %v2416_v23 = vpop.f32.mrf.mxu1 }
 0x387   : > { %3620 = vmatmul.msk.bf16.gmra.mxu1 %vm1700_vm0, %v6076_v63  ;;  %v2342_v2 = vpop.f32.mrf.mxu0 }
 0x38a   : > { %v2166_v14 = vpop.f32.mrf.mxu2 }
 0x38b   : > { %v2255_v18 = vpop.f32.mrf.mxu3  ;;  %v4308_v42 = vpack.c.bf16 %v2166_v14, %v2164_v3 }
 0x38c   : > { %v2418_v43 = vpop.f32.mrf.mxu1  ;;  %v4388_v4 = vpack.c.bf16 %v2255_v18, %v2253_v21 }
 0x38d   : > { %v4533_v29 = vpack.c.bf16 %v2418_v43, %v2416_v23  ;;  %4648 = vst [vmem:[%s5991_s16 + $0x250] sm:$0xff] %v4308_v42  }
 0x38e   : > { %4664 = vst [vmem:[%s5991_s16 + $0x2d0] sm:$0xff] %v4388_v4  }
 0x38f   : > { %4693 = vst [vmem:[%s5991_s16 + $0x3b8] sm:$0xff] %v4533_v29   ;;  %v2344_v63 = vpop.f32.mrf.mxu0 }
 0x390   : > { %v4468_v27 = vpack.c.bf16 %v2344_v63, %v2342_v2 }
 0x392   : > { %4680 = vst [vmem:[%s5991_s16 + $0x350] sm:$0xff] %v4468_v27   ;;  %v2169_v37 = vpop.f32.mrf.mxu2 }
 0x393   : > { %v2258_v0 = vpop.f32.mrf.mxu3 }
 0x394   : > { %v2421_v31 = vpop.f32.mrf.mxu1 }
 0x397   : > { %v2347_v13 = vpop.f32.mrf.mxu0 }
 0x39a   : > { %v2171_v35 = vpop.f32.mrf.mxu2 }
 0x39b   : > { %v2260_v9 = vpop.f32.mrf.mxu3  ;;  %v4313_v59 = vpack.c.bf16 %v2171_v35, %v2169_v37 }
 0x39c   : > { %v2423_v32 = vpop.f32.mrf.mxu1  ;;  %v4393_v57 = vpack.c.bf16 %v2260_v9, %v2258_v0 }
 0x39d   : > { %v4538_v24 = vpack.c.bf16 %v2423_v32, %v2421_v31  ;;  %4649 = vst [vmem:[%s5991_s16 + $0x258] sm:$0xff] %v4313_v59  }
 0x39e   : > { %4665 = vst [vmem:[%s5991_s16 + $0x2d8] sm:$0xff] %v4393_v57  }
 0x39f   : > { %4694 = vst [vmem:[%s5991_s16 + $0x3c0] sm:$0xff] %v4538_v24   ;;  %v2349_v33 = vpop.f32.mrf.mxu0 }
 0x3a0   : > { %v4473_v11 = vpack.c.bf16 %v2349_v33, %v2347_v13 }
 0x3a2   : > { %4681 = vst [vmem:[%s5991_s16 + $0x358] sm:$0xff] %v4473_v11   ;;  %v2174_v22 = vpop.f32.mrf.mxu2 }
 0x3a3   : > { %v2263_v58 = vpop.f32.mrf.mxu3 }
 0x3a4   : > { %v2426_v60 = vpop.f32.mrf.mxu1 }
 0x3a7   : > { %v2352_v25 = vpop.f32.mrf.mxu0 }
 0x3aa   : > { %v2176_v15 = vpop.f32.mrf.mxu2 }
 0x3ab   : > { %v2265_v50 = vpop.f32.mrf.mxu3  ;;  %v4318_v54 = vpack.c.bf16 %v2176_v15, %v2174_v22 }
 0x3ac   : > { %v2428_v30 = vpop.f32.mrf.mxu1  ;;  %v4398_v49 = vpack.c.bf16 %v2265_v50, %v2263_v58 }
 0x3ad   : > { %v4543_v7 = vpack.c.bf16 %v2428_v30, %v2426_v60  ;;  %4650 = vst [vmem:[%s5991_s16 + $0x260] sm:$0xff] %v4318_v54  }
 0x3ae   : > { %4666 = vst [vmem:[%s5991_s16 + $0x2e0] sm:$0xff] %v4398_v49  }
 0x3af   : > { %4695 = vst [vmem:[%s5991_s16 + $0x3c8] sm:$0xff] %v4543_v7   ;;  %v2354_v55 = vpop.f32.mrf.mxu0 }
 0x3b0   : > { %v4478_v44 = vpack.c.bf16 %v2354_v55, %v2352_v25 }
 0x3b2   : > { %4682 = vst [vmem:[%s5991_s16 + $0x360] sm:$0xff] %v4478_v44   ;;  %v2179_v19 = vpop.f32.mrf.mxu2 }
 0x3b3   : > { %v2268_v62 = vpop.f32.mrf.mxu3 }
 0x3b4   : > { %v2431_v34 = vpop.f32.mrf.mxu1 }
 0x3b7   : > { %v2357_v16 = vpop.f32.mrf.mxu0 }
 0x3ba   : > { %v2181_v51 = vpop.f32.mrf.mxu2 }
 0x3bb   : > { %v2270_v41 = vpop.f32.mrf.mxu3  ;;  %v4323_v12 = vpack.c.bf16 %v2181_v51, %v2179_v19 }
 0x3bc   : > { %v2433_v48 = vpop.f32.mrf.mxu1  ;;  %v4403_v10 = vpack.c.bf16 %v2270_v41, %v2268_v62 }
 0x3bd   : > { %v4548_v56 = vpack.c.bf16 %v2433_v48, %v2431_v34  ;;  %4651 = vst [vmem:[%s5991_s16 + $0x268] sm:$0xff] %v4323_v12  }
 0x3be   : > { %4667 = vst [vmem:[%s5991_s16 + $0x2e8] sm:$0xff] %v4403_v10  }
 0x3bf   : > { %4696 = vst [vmem:[%s5991_s16 + $0x3d0] sm:$0xff] %v4548_v56   ;;  %v2359_v38 = vpop.f32.mrf.mxu0 }
 0x3c0   : > { %v4483_v45 = vpack.c.bf16 %v2359_v38, %v2357_v16 }
 0x3c2   : > { %4683 = vst [vmem:[%s5991_s16 + $0x368] sm:$0xff] %v4483_v45   ;;  %v2184_v8 = vpop.f32.mrf.mxu2 }
 0x3c3   : > { %v2273_v17 = vpop.f32.mrf.mxu3 }
 0x3c4   : > { %v2436_v26 = vpop.f32.mrf.mxu1 }
 0x3c7   : > { %v2362_v28 = vpop.f32.mrf.mxu0 }
 0x3ca   : > { %v2186_v20 = vpop.f32.mrf.mxu2 }
 0x3cb   : > { %v2275_v1 = vpop.f32.mrf.mxu3  ;;  %v4328_v5 = vpack.c.bf16 %v2186_v20, %v2184_v8 }
 0x3cc   : > { %v2438_v39 = vpop.f32.mrf.mxu1  ;;  %v4408_v23 = vpack.c.bf16 %v2275_v1, %v2273_v17 }
 0x3cd   : > { %v4553_v53 = vpack.c.bf16 %v2438_v39, %v2436_v26  ;;  %4652 = vst [vmem:[%s5991_s16 + $0x270] sm:$0xff] %v4328_v5  }
 0x3ce   : > { %4668 = vst [vmem:[%s5991_s16 + $0x2f0] sm:$0xff] %v4408_v23  }
 0x3cf   : > { %4697 = vst [vmem:[%s5991_s16 + $0x3d8] sm:$0xff] %v4553_v53   ;;  %v2364_v46 = vpop.f32.mrf.mxu0 }
 0x3d0   : > { %v4488_v40 = vpack.c.bf16 %v2364_v46, %v2362_v28 }
 0x3d2   : > { %4684 = vst [vmem:[%s5991_s16 + $0x370] sm:$0xff] %v4488_v40   ;;  %v2189_v36 = vpop.f32.mrf.mxu2 }
 0x3d3   : > { %v2278_v47 = vpop.f32.mrf.mxu3 }
 0x3d4   : > { %v2441_v6 = vpop.f32.mrf.mxu1 }
 0x3d7   : > { %v2367_v43 = vpop.f32.mrf.mxu0 }
 0x3da   : > { %v2191_v3 = vpop.f32.mrf.mxu2 }
 0x3db   : > { %v2280_v21 = vpop.f32.mrf.mxu3  ;;  %v4333_v2 = vpack.c.bf16 %v2191_v3, %v2189_v36 }
 0x3dc   : > { %v2443_v52 = vpop.f32.mrf.mxu1  ;;  %v4413_v31 = vpack.c.bf16 %v2280_v21, %v2278_v47 }
 0x3dd   : > { %v4558_v61 = vpack.c.bf16 %v2443_v52, %v2441_v6  ;;  %4653 = vst [vmem:[%s5991_s16 + $0x278] sm:$0xff] %v4333_v2  }
 0x3de   : > { %4669 = vst [vmem:[%s5991_s16 + $0x2f8] sm:$0xff] %v4413_v31  }
 0x3df   : > { %4698 = vst [vmem:[%s5991_s16 + $0x3e0] sm:$0xff] %v4558_v61   ;;  %v2369_v14 = vpop.f32.mrf.mxu0 }
 0x3e0   : > { %v4493_v18 = vpack.c.bf16 %v2369_v14, %v2367_v43 }
 0x3e2   : > { %4685 = vst [vmem:[%s5991_s16 + $0x378] sm:$0xff] %v4493_v18  }
 0x3e4   : > { %v2446_v29 = vpop.f32.mrf.mxu1 }
 0x3ec   : > { %v2448_v42 = vpop.f32.mrf.mxu1 }
 0x3ed   : > { %v4563_v4 = vpack.c.bf16 %v2448_v42, %v2446_v29 }
 0x3ef   : > { %4699 = vst [vmem:[%s5991_s16 + $0x3e8] sm:$0xff] %v4563_v4  }
 0x3f4   : > { %v2451_v63 = vpop.f32.mrf.mxu1 }
 0x3fc   : > { %v2453_v27 = vpop.f32.mrf.mxu1 }
 0x3fd   : > { %v4568_v32 = vpack.c.bf16 %v2453_v27, %v2451_v63 }
 0x3ff   : > { %4700 = vst [vmem:[%s5991_s16 + $0x3f0] sm:$0xff] %v4568_v32  }
 0x404   : > { %v2456_v24 = vpop.f32.mrf.mxu1 }
 0x40c   : > { %v2458_v37 = vpop.f32.mrf.mxu1 }
 0x40d   : > { %v4573_v0 = vpack.c.bf16 %v2458_v37, %v2456_v24 }
 0x40f   : > { %4701 = vst [vmem:[%s5991_s16 + $0x3f8] sm:$0xff] %v4573_v0  }
 0x410   : > { %4863 = shalt.err (!%p4860_p0)
}
 0x411   : > { %s4939_s17 = smov 64   ;;  %s4940_s16 = smov 4  }
 0x412   : > { %4722 = dma.vmem_to_hbm [thread:$0]  (%p5028_p3), %s2997_s5, 16384, %s2999_s29, %s2981_s30, %s4939_s17, %s4939_s17, %s4940_s16  }
 0x413 PF: > { %p4734_p1 = scmp.ge.s32.totalorder %s4934_s28, 2  ;;  %s3013_s9 = sand.u32 1, %s4906_s21  }
 0x414   : > { %s3014_s14 = scalar_lea.sflag [#allocation4], %s3013_s9 }
 0x415   : > { %p4729_p2 = pnand %p4734_p1, %p5037_p8 }
 0x417   : > { %p4730_p4 = pneg %p4729_p2 }
 0x419   : > { %4901 = dma.done.wait (%p4730_p4), %s3014_s14, 16384  }
 0x41a   : > { %4903 = vsyncadd (%p4730_p4), %s3014_s14, 4294950912  ;;  %s20_s28 = sadd.s32 1, %s4934_s28   ;;  %s6470_s21 = smov %s4910_s22 }
 0x41b   : > { %p17_p5 = scmp.ge.s32.totalorder %s20_s28, 6   ;;  %s6471_s22 = smov %s4914_s23 }
 0x41c   : > { %s6472_s23 = smov %s5058_s20  ;;  %s6473_s24 = smov %s4926_s26 }
 0x41d   : > { %s6474_s25 = smov %s4930_s27  ;;  %s6475_s26 = smov %s6478_s7 }
 0x41e   : > { %s6476_s27 = smov %s6482_s8  ;;  %19 = sbr.rel (!%p17_p5) target bundleno = 8 (0x8), region = 97 }
 0x423   :  { %3020 = vsyncpa [#allocation3], 1 }
 0x424   :  { %3022 = vsyncpa [#allocation3 + $0x1], 1 }
 0x425   :  { %3023 = vsyncpa [#allocation4], 1 }
 0x426   :  { %3025 = vsyncpa [#allocation4 + $0x1], 1 }

</bundles_post_ra>
